<compile_context>
chip_gen: v5e
topology: v5e:2x2
jax: 0.10.0
libtpu: 0.0.40
codegen_flags: <defaults>
</compile_context>

<pallas_src>
import functools

import jax
import jax.numpy as jnp
from jax.experimental import pallas as pl
from jax.experimental.pallas import tpu as pltpu


def _conv_taps_kernel(x_ref, w_ref, b_ref, o_ref, *, kh, kw, wp, m1):
    """One padded image per grid step.

    x_ref: (1, L, C)        bf16  flattened padded image, L = HP*WP + (KW-1)
    w_ref: (KH, KW, C, OCp) bf16  per-tap weight matrices (OC zero-padded to OCp)
    b_ref: (1, OCp)         f32   bias (zero-padded)
    o_ref: (1, M1, OCp)     f32   dense stride-1 output rows, M1 = OH1*WP
    """
    xi = x_ref[0]                                     # (L, C) bf16, stays in VMEM
    ocp = w_ref.shape[-1]
    acc = jnp.zeros((m1, ocp), jnp.float32)
    # KH*KW shifted matmuls accumulate the conv. Output position p = r*WP + q
    # reads input flat offset p + (i*WP + j), so each tap's lhs is a contiguous
    # row slice (no gather / no reshape).
    for i in range(kh):
        for j in range(kw):
            off = i * wp + j
            lhs = xi[off:off + m1, :]                 # (M1, C) bf16, contiguous
            acc = acc + jnp.dot(lhs, w_ref[i, j],
                                preferred_element_type=jnp.float32)
    acc = acc + b_ref[...]                            # (1, OCp) broadcast, f32
    o_ref[0] = jnp.maximum(acc, 0.0).astype(o_ref.dtype)   # single lane-dense store


@functools.partial(jax.jit, static_argnames=("stride", "padding"))
def conv2d_relu(x, weight, bias, *, stride=1, padding=0):
    """x: (N, C, H, W); weight: (OC, C, KH, KW); bias: (OC,). Returns NCHW."""
    n, c, h, w = x.shape
    oc, _, kh, kw = weight.shape
    hp, wp = h + 2 * padding, w + 2 * padding
    oh = (hp - kh) // stride + 1
    ow = (wp - kw) // stride + 1
    oh1 = hp - kh + 1                   # dense (stride-1) output rows computed
    m1 = oh1 * wp                       # matmul rows per image inside the kernel
    ocp = ((oc + 127) // 128) * 128     # lane-dense / MXU-wide output channels

    # --- input: NCHW -> NHWC, spatial zero-pad, flatten spatial, bf16 (1 pass) ---
    xh = jnp.transpose(x, (0, 2, 3, 1))                               # (N, H, W, C)
    xh = jnp.pad(xh, ((0, 0), (padding, padding), (padding, padding), (0, 0)))
    xf = xh.reshape(n, hp * wp, c)
    xf = jnp.pad(xf, ((0, 0), (0, kw - 1), (0, 0)))    # tail rows read by last taps
    xf = xf.astype(jnp.bfloat16)

    # --- weights / bias: per-tap (C, OCp) matrices, OC zero-padded ---
    wt = jnp.transpose(weight, (2, 3, 1, 0))                          # (KH, KW, C, OC)
    wt = jnp.pad(wt, ((0, 0), (0, 0), (0, 0), (0, ocp - oc))).astype(jnp.bfloat16)
    bt = jnp.pad(bias.astype(jnp.float32), (0, ocp - oc)).reshape(1, ocp)

    kernel = functools.partial(_conv_taps_kernel, kh=kh, kw=kw, wp=wp, m1=m1)
    out = pl.pallas_call(
        kernel,
        out_shape=jax.ShapeDtypeStruct((n, m1, ocp), jnp.float32),
        grid_spec=pltpu.PrefetchScalarGridSpec(
            num_scalar_prefetch=0,
            grid=(n,),
            in_specs=[
                pl.BlockSpec((1, hp * wp + kw - 1, c), lambda b: (b, 0, 0)),
                pl.BlockSpec((kh, kw, c, ocp), lambda b: (0, 0, 0, 0)),  # resident
                pl.BlockSpec((1, ocp), lambda b: (0, 0)),                # resident
            ],
            out_specs=pl.BlockSpec((1, m1, ocp), lambda b: (b, 0, 0)),
        ),
        compiler_params=pltpu.CompilerParams(
            dimension_semantics=("parallel",),     # batch shards across TCs (v7x)
            vmem_limit_bytes=32 * 1024 * 1024,     # explicit; safe on v5e/v6e/v7x
        ),
    )(xf, wt, bt)

    # --- epilogue: drop padded channels + garbage columns, subsample stride,
    #     convert back to NCHW only at the PyTorch module boundary ---
    out = out.reshape(n, oh1, wp, ocp)
    out = out[:, :(oh - 1) * stride + 1:stride, :(ow - 1) * stride + 1:stride, :oc]
    out = jnp.transpose(out, (0, 3, 1, 2))
    return out.astype(x.dtype)


if __name__ == "__main__":
    # Module config: Conv2d(in_ch=4, out_ch=8, kernel_size=3, strides=1,
    #                       activation='relu', padding=1)
    N, C, H, W = 2, 4, 16, 16
    OC, KH, KW = 8, 3, 3
    STRIDE, PAD = 1, 1

    key = jax.random.PRNGKey(0)
    kx, kw_, kb = jax.random.split(key, 3)
    x = jax.random.normal(kx, (N, C, H, W), dtype=jnp.float32)
    fan_in = C * KH * KW
    weight = jax.random.normal(kw_, (OC, C, KH, KW), dtype=jnp.float32) / jnp.sqrt(fan_in)
    bias = jax.random.normal(kb, (OC,), dtype=jnp.float32) * 0.1

    y = conv2d_relu(x, weight, bias, stride=STRIDE, padding=PAD)
    y = jax.block_until_ready(y)
    assert y.shape == (N, OC, H, W)

    # Reference 1: same bf16-rounded operands, f32 accumulation (isolates kernel bugs
    # from the expected bf16 operand quantization).
    xr = x.astype(jnp.bfloat16).astype(jnp.float32)
    wr = weight.astype(jnp.bfloat16).astype(jnp.float32)
    ref = jax.lax.conv_general_dilated(
        xr, wr, window_strides=(STRIDE, STRIDE),
        padding=[(PAD, PAD), (PAD, PAD)],
        dimension_numbers=("NCHW", "OIHW", "NCHW"),
        precision=jax.lax.Precision.HIGHEST)
    ref = jnp.maximum(ref + bias.reshape(1, OC, 1, 1), 0.0)
    assert jnp.allclose(y, ref, atol=1e-3, rtol=1e-3)

    # Reference 2: full-f32 conv; tolerance covers bf16 operand rounding.
    ref32 = jax.lax.conv_general_dilated(
        x, weight, window_strides=(STRIDE, STRIDE),
        padding=[(PAD, PAD), (PAD, PAD)],
        dimension_numbers=("NCHW", "OIHW", "NCHW"),
        precision=jax.lax.Precision.HIGHEST)
    ref32 = jnp.maximum(ref32 + bias.reshape(1, OC, 1, 1), 0.0)
    assert jnp.allclose(y, ref32, atol=5e-2, rtol=5e-2)

    print("KERNEL_OK")
</pallas_src>

<mosaic_0001>
module attributes {stable_mosaic.version = 11 : i64} {
  func.func @_conv_taps_kernel(%arg0: i32, %arg1: memref<1x326x4xbf16, #tpu.memory_space<vmem>>, %arg2: memref<3x3x4x128xbf16, #tpu.memory_space<vmem>>, %arg3: memref<1x128xf32, #tpu.memory_space<vmem>>, %arg4: memref<1x288x128xf32, #tpu.memory_space<vmem>>) attributes {dimension_semantics = [#tpu.dimension_semantics<parallel>], iteration_bounds = array<i64: 2>, scalar_prefetch = 0 : i64, scratch_operands = 0 : i64, tpu.core_type = #tpu.core_type<tc>, window_params = [{transform_indices = @transform_0, window_bounds = array<i64: 1, 326, 4>}, {pipeline_mode = #tpu.pipeline_mode<synchronous>, transform_indices = @transform_1, window_bounds = array<i64: 3, 3, 4, 128>}, {pipeline_mode = #tpu.pipeline_mode<synchronous>, transform_indices = @transform_2, window_bounds = array<i64: 1, 128>}, {transform_indices = @transform_3, window_bounds = array<i64: 1, 288, 128>}]} {
    %c0 = arith.constant 0 : index
    %c0_0 = arith.constant 0 : index
    %c0_1 = arith.constant 0 : index
    %0 = vector.load %arg1[%c0, %c0_0, %c0_1] : memref<1x326x4xbf16, #tpu.memory_space<vmem>>, vector<1x326x4xbf16>
    %1 = vector.shape_cast %0 : vector<1x326x4xbf16> to vector<326x4xbf16>
    %cst = arith.constant 0.000000e+00 : f32
    %2 = vector.broadcast %cst : f32 to vector<288x128xf32>
    %3 = vector.extract_strided_slice %1 {offsets = [0, 0], sizes = [288, 4], strides = [1, 1]} : vector<326x4xbf16> to vector<288x4xbf16>
    %c0_2 = arith.constant 0 : index
    %c0_3 = arith.constant 0 : index
    %c0_4 = arith.constant 0 : index
    %c0_5 = arith.constant 0 : index
    %4 = vector.load %arg2[%c0_2, %c0_3, %c0_4, %c0_5] : memref<3x3x4x128xbf16, #tpu.memory_space<vmem>>, vector<1x1x4x128xbf16>
    %5 = vector.shape_cast %4 : vector<1x1x4x128xbf16> to vector<4x128xbf16>
    %cst_6 = arith.constant dense<0.000000e+00> : vector<288x128xf32>
    %6 = tpu.matmul %3, %5, %cst_6 {dimension_numbers = #tpu.dot_dimension_numbers<[1], [0], [0], [1], [0, 0, 1, 1], [], []>} : vector<288x4xbf16>, vector<4x128xbf16>, vector<288x128xf32> -> vector<288x128xf32>
    %7 = arith.addf %2, %6 : vector<288x128xf32>
    %8 = vector.extract_strided_slice %1 {offsets = [1, 0], sizes = [288, 4], strides = [1, 1]} : vector<326x4xbf16> to vector<288x4xbf16>
    %c0_7 = arith.constant 0 : index
    %c1 = arith.constant 1 : index
    %c0_8 = arith.constant 0 : index
    %c0_9 = arith.constant 0 : index
    %9 = vector.load %arg2[%c0_7, %c1, %c0_8, %c0_9] : memref<3x3x4x128xbf16, #tpu.memory_space<vmem>>, vector<1x1x4x128xbf16>
    %10 = vector.shape_cast %9 : vector<1x1x4x128xbf16> to vector<4x128xbf16>
    %cst_10 = arith.constant dense<0.000000e+00> : vector<288x128xf32>
    %11 = tpu.matmul %8, %10, %cst_10 {dimension_numbers = #tpu.dot_dimension_numbers<[1], [0], [0], [1], [0, 0, 1, 1], [], []>} : vector<288x4xbf16>, vector<4x128xbf16>, vector<288x128xf32> -> vector<288x128xf32>
    %12 = arith.addf %7, %11 : vector<288x128xf32>
    %13 = vector.extract_strided_slice %1 {offsets = [2, 0], sizes = [288, 4], strides = [1, 1]} : vector<326x4xbf16> to vector<288x4xbf16>
    %c0_11 = arith.constant 0 : index
    %c2 = arith.constant 2 : index
    %c0_12 = arith.constant 0 : index
    %c0_13 = arith.constant 0 : index
    %14 = vector.load %arg2[%c0_11, %c2, %c0_12, %c0_13] : memref<3x3x4x128xbf16, #tpu.memory_space<vmem>>, vector<1x1x4x128xbf16>
    %15 = vector.shape_cast %14 : vector<1x1x4x128xbf16> to vector<4x128xbf16>
    %cst_14 = arith.constant dense<0.000000e+00> : vector<288x128xf32>
    %16 = tpu.matmul %13, %15, %cst_14 {dimension_numbers = #tpu.dot_dimension_numbers<[1], [0], [0], [1], [0, 0, 1, 1], [], []>} : vector<288x4xbf16>, vector<4x128xbf16>, vector<288x128xf32> -> vector<288x128xf32>
    %17 = arith.addf %12, %16 : vector<288x128xf32>
    %18 = vector.extract_strided_slice %1 {offsets = [18, 0], sizes = [288, 4], strides = [1, 1]} : vector<326x4xbf16> to vector<288x4xbf16>
    %c1_15 = arith.constant 1 : index
    %c0_16 = arith.constant 0 : index
    %c0_17 = arith.constant 0 : index
    %c0_18 = arith.constant 0 : index
    %19 = vector.load %arg2[%c1_15, %c0_16, %c0_17, %c0_18] : memref<3x3x4x128xbf16, #tpu.memory_space<vmem>>, vector<1x1x4x128xbf16>
    %20 = vector.shape_cast %19 : vector<1x1x4x128xbf16> to vector<4x128xbf16>
    %cst_19 = arith.constant dense<0.000000e+00> : vector<288x128xf32>
    %21 = tpu.matmul %18, %20, %cst_19 {dimension_numbers = #tpu.dot_dimension_numbers<[1], [0], [0], [1], [0, 0, 1, 1], [], []>} : vector<288x4xbf16>, vector<4x128xbf16>, vector<288x128xf32> -> vector<288x128xf32>
    %22 = arith.addf %17, %21 : vector<288x128xf32>
    %23 = vector.extract_strided_slice %1 {offsets = [19, 0], sizes = [288, 4], strides = [1, 1]} : vector<326x4xbf16> to vector<288x4xbf16>
    %c1_20 = arith.constant 1 : index
    %c1_21 = arith.constant 1 : index
    %c0_22 = arith.constant 0 : index
    %c0_23 = arith.constant 0 : index
    %24 = vector.load %arg2[%c1_20, %c1_21, %c0_22, %c0_23] : memref<3x3x4x128xbf16, #tpu.memory_space<vmem>>, vector<1x1x4x128xbf16>
    %25 = vector.shape_cast %24 : vector<1x1x4x128xbf16> to vector<4x128xbf16>
    %cst_24 = arith.constant dense<0.000000e+00> : vector<288x128xf32>
    %26 = tpu.matmul %23, %25, %cst_24 {dimension_numbers = #tpu.dot_dimension_numbers<[1], [0], [0], [1], [0, 0, 1, 1], [], []>} : vector<288x4xbf16>, vector<4x128xbf16>, vector<288x128xf32> -> vector<288x128xf32>
    %27 = arith.addf %22, %26 : vector<288x128xf32>
    %28 = vector.extract_strided_slice %1 {offsets = [20, 0], sizes = [288, 4], strides = [1, 1]} : vector<326x4xbf16> to vector<288x4xbf16>
    %c1_25 = arith.constant 1 : index
    %c2_26 = arith.constant 2 : index
    %c0_27 = arith.constant 0 : index
    %c0_28 = arith.constant 0 : index
    %29 = vector.load %arg2[%c1_25, %c2_26, %c0_27, %c0_28] : memref<3x3x4x128xbf16, #tpu.memory_space<vmem>>, vector<1x1x4x128xbf16>
    %30 = vector.shape_cast %29 : vector<1x1x4x128xbf16> to vector<4x128xbf16>
    %cst_29 = arith.constant dense<0.000000e+00> : vector<288x128xf32>
    %31 = tpu.matmul %28, %30, %cst_29 {dimension_numbers = #tpu.dot_dimension_numbers<[1], [0], [0], [1], [0, 0, 1, 1], [], []>} : vector<288x4xbf16>, vector<4x128xbf16>, vector<288x128xf32> -> vector<288x128xf32>
    %32 = arith.addf %27, %31 : vector<288x128xf32>
    %33 = vector.extract_strided_slice %1 {offsets = [36, 0], sizes = [288, 4], strides = [1, 1]} : vector<326x4xbf16> to vector<288x4xbf16>
    %c2_30 = arith.constant 2 : index
    %c0_31 = arith.constant 0 : index
    %c0_32 = arith.constant 0 : index
    %c0_33 = arith.constant 0 : index
    %34 = vector.load %arg2[%c2_30, %c0_31, %c0_32, %c0_33] : memref<3x3x4x128xbf16, #tpu.memory_space<vmem>>, vector<1x1x4x128xbf16>
    %35 = vector.shape_cast %34 : vector<1x1x4x128xbf16> to vector<4x128xbf16>
    %cst_34 = arith.constant dense<0.000000e+00> : vector<288x128xf32>
    %36 = tpu.matmul %33, %35, %cst_34 {dimension_numbers = #tpu.dot_dimension_numbers<[1], [0], [0], [1], [0, 0, 1, 1], [], []>} : vector<288x4xbf16>, vector<4x128xbf16>, vector<288x128xf32> -> vector<288x128xf32>
    %37 = arith.addf %32, %36 : vector<288x128xf32>
    %38 = vector.extract_strided_slice %1 {offsets = [37, 0], sizes = [288, 4], strides = [1, 1]} : vector<326x4xbf16> to vector<288x4xbf16>
    %c2_35 = arith.constant 2 : index
    %c1_36 = arith.constant 1 : index
    %c0_37 = arith.constant 0 : index
    %c0_38 = arith.constant 0 : index
    %39 = vector.load %arg2[%c2_35, %c1_36, %c0_37, %c0_38] : memref<3x3x4x128xbf16, #tpu.memory_space<vmem>>, vector<1x1x4x128xbf16>
    %40 = vector.shape_cast %39 : vector<1x1x4x128xbf16> to vector<4x128xbf16>
    %cst_39 = arith.constant dense<0.000000e+00> : vector<288x128xf32>
    %41 = tpu.matmul %38, %40, %cst_39 {dimension_numbers = #tpu.dot_dimension_numbers<[1], [0], [0], [1], [0, 0, 1, 1], [], []>} : vector<288x4xbf16>, vector<4x128xbf16>, vector<288x128xf32> -> vector<288x128xf32>
    %42 = arith.addf %37, %41 : vector<288x128xf32>
    %43 = vector.extract_strided_slice %1 {offsets = [38, 0], sizes = [288, 4], strides = [1, 1]} : vector<326x4xbf16> to vector<288x4xbf16>
    %c2_40 = arith.constant 2 : index
    %c2_41 = arith.constant 2 : index
    %c0_42 = arith.constant 0 : index
    %c0_43 = arith.constant 0 : index
    %44 = vector.load %arg2[%c2_40, %c2_41, %c0_42, %c0_43] : memref<3x3x4x128xbf16, #tpu.memory_space<vmem>>, vector<1x1x4x128xbf16>
    %45 = vector.shape_cast %44 : vector<1x1x4x128xbf16> to vector<4x128xbf16>
    %cst_44 = arith.constant dense<0.000000e+00> : vector<288x128xf32>
    %46 = tpu.matmul %43, %45, %cst_44 {dimension_numbers = #tpu.dot_dimension_numbers<[1], [0], [0], [1], [0, 0, 1, 1], [], []>} : vector<288x4xbf16>, vector<4x128xbf16>, vector<288x128xf32> -> vector<288x128xf32>
    %47 = arith.addf %42, %46 : vector<288x128xf32>
    %c0_45 = arith.constant 0 : index
    %c0_46 = arith.constant 0 : index
    %48 = vector.load %arg3[%c0_45, %c0_46] : memref<1x128xf32, #tpu.memory_space<vmem>>, vector<1x128xf32>
    %49 = vector.broadcast %48 : vector<1x128xf32> to vector<288x128xf32>
    %50 = arith.addf %47, %49 : vector<288x128xf32>
    %cst_47 = arith.constant 0.000000e+00 : f32
    %51 = vector.broadcast %cst_47 : f32 to vector<288x128xf32>
    %52 = arith.maximumf %50, %51 : vector<288x128xf32>
    %c0_48 = arith.constant 0 : index
    %c0_49 = arith.constant 0 : index
    %c0_50 = arith.constant 0 : index
    %53 = vector.load %arg4[%c0_48, %c0_49, %c0_50] : memref<1x288x128xf32, #tpu.memory_space<vmem>>, vector<1x288x128xf32>
    %54 = vector.shape_cast %53 : vector<1x288x128xf32> to vector<288x128xf32>
    %55 = vector.shape_cast %52 : vector<288x128xf32> to vector<1x288x128xf32>
    tpu.vector_store %arg4[%c0_48, %c0_49, %c0_50], %55 {strides = array<i32>} : memref<1x288x128xf32, #tpu.memory_space<vmem>>, vector<1x288x128xf32>,
    return
  }
  func.func @transform_0(%arg0: i32) -> (i32, i32, i32) {
    %c0_i32 = arith.constant 0 : i32
    %c0_i32_0 = arith.constant 0 : i32
    %c0_i32_1 = arith.constant 0 : i32
    return %arg0, %c0_i32, %c0_i32_0 : i32, i32, i32
  }
  func.func @transform_1(%arg0: i32) -> (i32, i32, i32, i32) {
    %c0_i32 = arith.constant 0 : i32
    %c0_i32_0 = arith.constant 0 : i32
    %c0_i32_1 = arith.constant 0 : i32
    %c0_i32_2 = arith.constant 0 : i32
    %c0_i32_3 = arith.constant 0 : i32
    return %c0_i32, %c0_i32_0, %c0_i32_1, %c0_i32_2 : i32, i32, i32, i32
  }
  func.func @transform_2(%arg0: i32) -> (i32, i32) {
    %c0_i32 = arith.constant 0 : i32
    %c0_i32_0 = arith.constant 0 : i32
    %c0_i32_1 = arith.constant 0 : i32
    return %c0_i32, %c0_i32_0 : i32, i32
  }
  func.func @transform_3(%arg0: i32) -> (i32, i32, i32) {
    %c0_i32 = arith.constant 0 : i32
    %c0_i32_0 = arith.constant 0 : i32
    %c0_i32_1 = arith.constant 0 : i32
    return %arg0, %c0_i32, %c0_i32_0 : i32, i32, i32
  }
}

</mosaic_0001>

<bundles_post_ra>
// kernel: conv2d_relu.1
= control target key start
LH: loop header
LB: loop body
LE: loop exit
PB: predicated region body
PF: predicated region fallthrough
CT: control target
= control target key end

     0   :  { %s2827_s12 = smov 0   ;;  %s3871_s0 = inlined_call_operand.vmem [shape: bf16[2,326,4], index: 0, kind: input, shape index: {}]   ;;  %s3872_s1 = inlined_call_operand.vmem [shape: bf16[3,3,4,128], index: 1, kind: input, shape index: {}]   ;;  %s3873_s2 = inlined_call_operand.vmem [shape: f32[1,128], index: 2, kind: input, shape index: {}]   ;;  %s3874_s3 = inlined_call_operand.vmem [shape: f32[2,288,128], index: 3, kind: output, shape index: {}]  }
   0x1 LB: > { %s2489_s13 = sadd.s32 4294967295, %s2805_s12   ;;  %p2493_p0 = scmp.ge.s32.totalorder %s2805_s12, 1  ;;  %s2805_s12 = sphi %s2827_s12, %s13_s12  }
   0x2   : > { %p137_p1 = scmp.lt.s32.totalorder %s2805_s12, 3 }
   0x4   : > { %p138_p2 = pnand %p2493_p0, %p137_p1 }
   0x6   : > { %141 = sbr.rel (%p138_p2) target bundleno = 817 (0x331), region = 32 }
   0xb   : > { %v2496_v0 = vld [vmem:[%s3872_s1 + $0x2] sm:$0x3]  ;;  %vm513_vm0 = vcmask 1041408   ;;  %p161_p3 = scmp.lt.s32.totalorder %s2489_s13, 1  ;;  %v2605_v2 = vld [vmem:[%s3872_s1 + $0x4] sm:$0x3] }
   0xc   : > { %v515_v1 = vsel %vm513_vm0, %v2496_v0, 0  ;;  %v213_v3 = vld [vmem:[%s3872_s1] sm:$0x3]  ;;  %v849_v4 = vsel %vm513_vm0, %v2605_v2, 0  ;;  %v2643_v6 = vld [vmem:[%s3872_s1 + $0x8] sm:$0x3] }
   0xd   : > { %2768 = vmatpush.bf16.msra.mxu1 %v515_v1  ;;  %2769 = vmatpush.bf16.msra.mxu2 %v515_v1  ;;  %s4012_s13 = smov (!%p161_p3, %s2489_s13), 1  ;;  %v653_v5 = vsel %vm513_vm0, %v213_v3, 0  ;;  %v1285_v7 = vsel %vm513_vm0, %v2643_v6, 0  ;;  %vm309_vm1 = vsmask.f32 7424  ;;  %vm458_vm2 = vcmask 31744  }
   0xe   : > { %524 = vmatpush.bf16.msra.mxu0 %v515_v1  ;;  %s2771_s22 = smul.u32 164, %s4012_s13  ;;  %2770 = vmatpush.bf16.msra.mxu3 %v515_v1  ;;  %v2624_v45 = vld [vmem:[%s3872_s1 + $0x6] sm:$0x3]  ;;  %vm756_vm3 = vcmask 1046528   ;;  %vm1144_vm4 = vsmask.f32 6400 }
   0xf   : > { %v1005_v53 = vsel %vm513_vm0, %v2624_v45, 0  ;;  %vm1812_vm5 = vsmask.f32 5376  ;;  %vm1424_vm6 = vcmask 1045504   ;;  %vm2092_vm7 = vcmask 1044480   ;;  %s2772_s11 = smul.u32 288, %s4012_s13 }
  0x10   : > { %s2857_s25 = scalar_lea.vmem %s3871_s0, %s2771_s22 }
  0x11   : > { %858 = vmatpush.bf16.msrb.mxu2 %v849_v4  ;;  %662 = vmatpush.bf16.msrb.mxu1 %v653_v5  ;;  %v2860_v8 = vld [vmem:[%s2857_s25 + $0x28] sm:$0xff]  ;;  %v2863_v9 = vld [vmem:[%s2857_s25 + $0x30] sm:$0xff]  ;;  %v2869_v11 = vld [vmem:[%s2857_s25 + $0x58] sm:$0xff]  ;;  %s3654_s16 = scalar_lea.vmem %s3874_s3, %s2772_s11 }
  0x12   : > { %1294 = vmatpush.bf16.msrb.mxu0 %v1285_v7  ;;  %v2866_v10 = vld [vmem:[%s2857_s25 + $0x50] sm:$0xff]  ;;  %v2872_v12 = vld [vmem:[%s2857_s25] sm:$0xff]  ;;  %v2875_v13 = vld [vmem:[%s2857_s25 + $0x8] sm:$0xff]  ;;  %v2878_v14 = vshll.u32 %v2860_v8, 16  ;;  %v2881_v15 = vshrl.u32 %v2860_v8, 16  ;;  %v2884_v16 = vshll.u32 %v2863_v9, 16  ;;  %1014 = vmatpush.bf16.msrb.mxu3 %v1005_v53 }
  0x13   : > { %v2887_v17 = vshll.u32 %v2866_v10, 16  ;;  %v2890_v18 = vshrl.u32 %v2866_v10, 16  ;;  %v2893_v19 = vshll.u32 %v2869_v11, 16  ;;  %v311_v20 = vshrl.u32 %v2872_v12, 16  ;;  %v2911_v31 = vld [vmem:[%s2857_s25 + $0x78] sm:$0xff]  ;;  %v2914_v32 = vld [vmem:[%s2857_s25 + $0x80] sm:$0xff] }
  0x14   : > { %3906 = vst [vmem:[#allocation2_spill] sm:$0xff] %v2878_v14  ;;  %v313_v21 = vshll.u32 %v2872_v12, 16  ;;  %v352_v22 = vrot.slane %v2878_v14, 1  ;;  %v360_v23 = vrot.slane %v2884_v16, 1  ;;  %v3875_v25 = vshll.u32 %v2875_v13, 16  ;;  %v2922_v37 = vld [vmem:[%s2857_s25 + $0x38] sm:$0xff] }
  0x15   : > { %3907 = vst [vmem:[#allocation3_spill] sm:$0xff] %v2881_v15  ;;  %v392_v24 = vrot.slane %v2887_v17, 1  ;;  %v400_v26 = vrot.slane %v2893_v19, 1  ;;  %v2926_v38 = vld [vmem:[%s2857_s25 + $0x60] sm:$0xff]  ;;  %v2929_v39 = vshll.u32 %v2911_v31, 16  ;;  %v2932_v40 = vshrl.u32 %v2911_v31, 16 }
  0x16   : > { %3908 = vst [vmem:[#allocation4_spill] sm:$0xff] %v2884_v16  ;;  %v315_v27 = vrot.slane %v313_v21, 1  ;;  %v356_v28 = vor.u32 %v2881_v15, %v352_v22  ;;  %v320_v30 = vrot.slane %v3875_v25, 1  ;;  %v2935_v41 = vshll.u32 %v2914_v32, 16  ;;  %v2938_v42 = vld [vmem:[%s2857_s25 + $0x10] sm:$0xff]  ;;  %v2972_v59 = vld [vmem:[%s2857_s25 + $0x88] sm:$0xff] }
  0x17   : > { %3909 = vst [vmem:[#allocation5_spill] sm:$0xff] %v2887_v17  ;;  %v396_v29 = vor.u32 %v2890_v18, %v392_v24  ;;  %v3877_v43 = vrot.slane %v2929_v39, 1  ;;  %v2946_v46 = vshrl.u32 %v2863_v9, 16  ;;  %v2949_v47 = vshll.u32 %v2922_v37, 16  ;;  %v2975_v60 = vld [vmem:[%s2857_s25 + $0x48] sm:$0xff]  ;;  %v2995_v5 = vld [vmem:[%s2857_s25 + $0x40] sm:$0xff] }
  0x18   : > { %3910 = vst [vmem:[#allocation6_spill] sm:$0xff] %v2890_v18  ;;  %v316_v33 = vor.u32 %v315_v27, %v311_v20  ;;  %v361_v34 = vsel %vm309_vm1, %v356_v28, %v360_v23  ;;  %v440_v44 = vrot.slane %v2935_v41, 1  ;;  %v2952_v48 = vshrl.u32 %v2869_v11, 16  ;;  %v2998_v6 = vld [vmem:[%s2857_s25 + $0x68] sm:$0xff]  ;;  %v3011_v27 = vld [vmem:[%s2857_s25 + $0x90] sm:$0xff]  }
  0x19   : > { %v401_v35 = vsel %vm309_vm1, %v396_v29, %v400_v26  ;;  %2574 = vmatmul.msk.bf16.vlgmr.msra.gmra.mxu1 %vm458_vm2, %v361_v34  ;;  %3911 = vst [vmem:[#allocation7_spill] sm:$0xff] %v2946_v46  ;;  %v2955_v49 = vshll.u32 %v2926_v38, 16  ;;  %v436_v50 = vor.u32 %v2932_v40, %v3877_v43  ;;  %v3876_v51 = vshrl.u32 %v2875_v13, 16 }
  0x1a   : > { %2579 = vmatmul.msk.bf16.vlgmr.msra.gmra.mxu2 %vm458_vm2, %v401_v35  ;;  %v321_v36 = vsel %vm309_vm1, %v316_v33, %v320_v30  ;;  %3912 = vst [vmem:[#allocation8_spill] sm:$0xff] %v2949_v47  ;;  %v2962_v52 = vshll.u32 %v2938_v42, 16  ;;  %v364_v55 = vor.u32 %v2946_v46, %v360_v23  ;;  %v368_v56 = vrot.slane %v2949_v47, 1 }
  0x1b   : > { %2569 = vmatmul.msk.bf16.vlgmr.msra.gmra.mxu0 %vm458_vm2, %v321_v36  ;;  %v441_v54 = vsel %vm309_vm1, %v436_v50, %v440_v44  ;;  %v404_v57 = vor.u32 %v2952_v48, %v400_v26  ;;  %v408_v58 = vrot.slane %v2955_v49, 1  ;;  %v324_v61 = vor.u32 %v3876_v51, %v320_v30  ;;  %v3008_v26 = vld [vmem:[%s2857_s25 + $0x18] sm:$0xff]  ;;  %3917 = vst [vmem:[#allocation13_spill] sm:$0xff] %v3011_v27  ;;  %v3028_v36 = vld [vmem:[%s2857_s25 + $0x20] sm:$0xff] }
  0x1c   : > { %2584 = vmatmul.msk.bf16.vlgmr.msra.gmra.mxu3 %vm458_vm2, %v441_v54  ;;  %v328_v62 = vrot.slane %v2962_v52, 1  ;;  %v369_v63 = vsel %vm309_vm1, %v364_v55, %v368_v56  ;;  %v2983_v1 = vshrl.u32 %v2914_v32, 16  ;;  %v2986_v2 = vshll.u32 %v2972_v59, 16  ;;  %3916 = vst [vmem:[#allocation12_spill] sm:$0xff] %v3008_v26 }
  0x1d   : > { %v409_v0 = vsel %vm309_vm1, %v404_v57, %v408_v58  ;;  %v2989_v3 = vshll.u32 %v2975_v60, 16  ;;  %v3005_v23 = vshrl.u32 %v2975_v60, 16  ;;  %v3015_v29 = vshrl.u32 %v2922_v37, 16  ;;  %3920 = vst [vmem:[#allocation16_spill] sm:$0xff] %v3028_v36 }
  0x1e   : > { %3913 = vst [vmem:[#allocation9_spill] sm:$0xff] %v2986_v2  ;;  %v329_v4 = vsel %vm309_vm1, %v324_v61, %v328_v62  ;;  %v444_v7 = vor.u32 %v2983_v1, %v440_v44  ;;  %v448_v20 = vrot.slane %v2986_v2, 1  ;;  %v3018_v30 = vshll.u32 %v2995_v5, 16 }
  0x1f   : > { %3914 = vst [vmem:[#allocation10_spill] sm:$0xff] %v2989_v3  ;;  %v384_v21 = vrot.slane %v2989_v3, 1  ;;  %v3021_v33 = vshrl.u32 %v2926_v38, 16  ;;  %v3024_v34 = vshll.u32 %v2998_v6, 16  ;;  %v2760_v44 = vunpack.c.l.b16 %v3011_v27 }
  0x20   : > { %3915 = vst [vmem:[#allocation11_spill] sm:$0xff] %v3005_v23  ;;  %v449_v35 = vsel %vm309_vm1, %v444_v7, %v448_v20  ;;  %v3037_v50 = vshrl.u32 %v2938_v42, 16  ;;  %v3040_v53 = vshll.u32 %v3008_v26, 16  ;;  %v372_v54 = vor.u32 %v3015_v29, %v368_v56 }
  0x21   : > { %v388_v28 = vor.u32 %v3005_v23, %v384_v21  ;;  %3918 = vst [vmem:[#allocation14_spill] sm:$0xff] %v3015_v29  ;;  %v376_v55 = vrot.slane %v3018_v30, 1  ;;  %v412_v57 = vor.u32 %v3021_v33, %v408_v58  ;;  %v416_v61 = vrot.slane %v3024_v34, 1 }
  0x22   : > { %3919 = vst [vmem:[#allocation15_spill] sm:$0xff] %v3018_v30  ;;  %v3062_v25 = vshrl.u32 %v3028_v36, 16 }
  0x23   : > { %v3034_v45 = vsel %vm309_vm1, %v388_v28, %v392_v24  ;;  %3921 = vst [vmem:[#allocation17_spill] sm:$0xff] %v3040_v53  ;;  %v3048_v24 = vshll.u32 %v3028_v36, 16  ;;  %v377_v56 = vsel %vm309_vm1, %v372_v54, %v376_v55  ;;  %v417_v7 = vsel %vm309_vm1, %v412_v57, %v416_v61  ;;  %v3070_v54 = vld [vmem:[%s2857_s25 + $0x70] sm:$0xff] }
  0x24   : > { %v3058_v28 = vshrl.u32 %v2972_v59, 16  ;;  %3925 = vst [vmem:[#allocation21_spill] sm:$0xff] %v3062_v25 }
  0x25   : > { %3922 = vst [vmem:[#allocation18_spill] sm:$0xff] %v3048_v24  ;;  %v344_v58 = vrot.slane %v3048_v24, 1 }
  0x26   : > { %3924 = vst [vmem:[#allocation20_spill] sm:$0xff] %v3058_v28  ;;  %v452_v57 = vor.u32 %v3058_v28, %v448_v20 }
  0x29   : > { %2575 = vmatmul.msk.bf16.gmra.mxu1 %vm458_vm2, %v369_v63  ;;  %v3050_v63 = vpack.c.b16 %v2760_v44, %v2760_v44 }
  0x2a   : > { %2580 = vmatmul.msk.bf16.gmra.mxu2 %vm458_vm2, %v409_v0  ;;  %v332_v0 = vor.u32 %v3037_v50, %v328_v62  ;;  %v348_v62 = vor.u32 %v3062_v25, %v344_v58 }
  0x2b   : > { %2570 = vmatmul.msk.bf16.gmra.mxu0 %vm458_vm2, %v329_v4  ;;  %3923 = vst [vmem:[#allocation19_spill] sm:$0xff] %v3050_v63  ;;  %v336_v4 = vrot.slane %v3040_v53, 1 }
  0x2c   : > { %2585 = vmatmul.msk.bf16.gmra.mxu3 %vm458_vm2, %v449_v35  ;;  %v454_v35 = vshll.u32 %v3050_v63, 16  ;;  %v353_v43 = vsel %vm309_vm1, %v348_v62, %v352_v22  ;;  %v3077_v63 = vshrl.u32 %v2995_v5, 16 }
  0x2d   : > { %v337_v44 = vsel %vm309_vm1, %v332_v0, %v336_v4  ;;  %v3080_v0 = vshrl.u32 %v2998_v6, 16 }
  0x2e   : > { %v456_v51 = vrot.slane %v454_v35, 1  ;;  %3926 = vst [vmem:[#allocation22_spill] sm:$0xff] %v3077_v63  ;;  %v380_v20 = vor.u32 %v3077_v63, %v376_v55  ;;  %v2681_v55 = vld [vmem:[%s3872_s1 + $0xc] sm:$0x3] }
  0x2f   : > { %v420_v22 = vor.u32 %v3080_v0, %v416_v61  ;;  %v760_v61 = vrot.slane %v2938_v42, 1 }
  0x30   : > { %v385_v2 = vsel %vm309_vm1, %v380_v20, %v384_v21  ;;  %v1673_v21 = vsel %vm513_vm0, %v2681_v55, 0 }
  0x31   : > { %1682 = vmatpush.bf16.msra.mxu2 %v1673_v21  ;;  %v762_v21 = vrot.slane %v3008_v26, 1 }
  0x39   : > { %2576 = vmatmul.msk.bf16.gmra.mxu1 %vm458_vm2, %v377_v56  ;;  %v3083_v56 = vshll.u32 %v3070_v54, 16 }
  0x3a   : > { %2581 = vmatmul.msk.bf16.gmra.mxu2 %vm458_vm2, %v417_v7  ;;  %v457_v7 = vsel %vm309_vm1, %v452_v57, %v456_v51  ;;  %v758_v51 = vrot.slane %v2875_v13, 1 }
  0x3b   : > { %2571 = vmatmul.msk.bf16.gmra.mxu0 %vm458_vm2, %v337_v44  ;;  %v3087_v44 = vshrl.u32 %v3008_v26, 16  ;;  %v424_v35 = vrot.slane %v3083_v56, 1 }
  0x3c   : > { %2586 = vmatmul.msk.bf16.gmra.mxu3 %vm458_vm2, %v457_v7  ;;  %v3119_v7 = vshrl.u32 %v3070_v54, 16  ;;  %v761_v20 = vsel %vm756_vm3, %v758_v51, %v760_v61 }
  0x3d   : > { %v340_v62 = vor.u32 %v3087_v44, %v336_v4  ;;  %v425_v28 = vsel %vm309_vm1, %v420_v22, %v424_v35  ;;  %v2700_v4 = vld [vmem:[%s3872_s1 + $0xe] sm:$0x3] }
  0x3e   : > { %v428_v22 = vor.u32 %v3119_v7, %v424_v35  ;;  %v3929_v35 = vshll.u32 %v2875_v13, 16 }
  0x3f   : > { %v345_v27 = vsel %vm309_vm1, %v340_v62, %v344_v58  ;;  %v1953_v58 = vsel %vm513_vm0, %v2700_v4, 0  ;;  %v3927_v62 = vrot.slane %v2929_v39, 1  ;;  %v763_v4 = vsel %vm756_vm3, %v760_v61, %v762_v21 }
  0x40   : > { %1962 = vmatpush.bf16.msra.mxu3 %v1953_v58 }
  0x41   : > { %v433_v55 = vsel %vm309_vm1, %v428_v22, %v3927_v62 }
  0x49   : > { %2577 = vmatmul.msk.bf16.gmra.mxu1 %vm458_vm2, %v385_v2  ;;  %v2662_v2 = vld [vmem:[%s3872_s1 + $0xa] sm:$0x3] }
  0x4a   : > { %2582 = vmatmul.msk.bf16.gmra.mxu2 %vm458_vm2, %v425_v28  ;;  %v1517_v28 = vsel %vm513_vm0, %v2662_v2, 0  ;;  %v3928_v2 = vshrl.u32 %v2875_v13, 16 }
  0x4b   : > { %2572 = vmatmul.msk.bf16.gmra.mxu0 %vm458_vm2, %v345_v27  ;;  %v2719_v27 = vld [vmem:[%s3872_s1 + $0x10] sm:$0x3]  ;;  %1526 = vmatpush.bf16.msra.mxu1 %v1517_v28  ;;  %v1146_v28 = vrot.slane %v3929_v35, 2  ;;  %v1152_v35 = vrot.slane %v3087_v44, 1 }
  0x4c   : > { %v2185_v57 = vsel %vm513_vm0, %v2719_v27, 0  ;;  %2625 = vmatmul.msk.bf16.vlgmr.msrb.gmra.mxu3 %vm458_vm2, %v761_v20  ;;  %v1145_v58 = vrot.slane %v3928_v2, 1  ;;  %v1148_v27 = vrot.slane %v3037_v50, 1 }
  0x4d   : > { %2194 = vmatpush.bf16.msra.mxu0 %v2185_v57  ;;  %v1149_v57 = vrot.slane %v2962_v52, 2 }
  0x4e   : > { %v1147_v22 = vor.u32 %v1146_v28, %v1145_v58  ;;  %v1153_v58 = vrot.slane %v3040_v53, 2 }
  0x59   : > { %2578 = vmatmul.msk.bf16.gmra.mxu1 %vm458_vm2, %v3034_v45  ;;  %v757_v45 = vrot.slane %v2872_v12, 1 }
  0x5a   : > { %2583 = vmatmul.msk.bf16.gmra.mxu2 %vm458_vm2, %v433_v55  ;;  %v764_v55 = vrot.slane %v3028_v36, 1 }
  0x5b   : > { %2573 = vmatmul.msk.bf16.gmra.mxu0 %vm458_vm2, %v353_v43  ;;  %v1150_v43 = vor.u32 %v1149_v57, %v1148_v27  ;;  %v759_v62 = vsel %vm756_vm3, %v757_v45, %v758_v51  ;;  %v1154_v51 = vor.u32 %v1153_v58, %v1152_v35  ;;  %v1156_v27 = vrot.slane %v3062_v25, 1 }
  0x5c   : > { %2626 = vmatmul.msk.bf16.gmra.mxu3 %vm458_vm2, %v763_v4  ;;  %v765_v2 = vsel %vm756_vm3, %v762_v21, %v764_v55  ;;  %v1157_v57 = vrot.slane %v3048_v24, 2 }
  0x5d   : > { %v1151_v61 = vsel %vm1144_vm4, %v1147_v22, %v1150_v43  ;;  %v1155_v28 = vsel %vm1144_vm4, %v1150_v43, %v1154_v51  ;;  %v1160_v43 = vrot.slane %v2881_v15, 1 }
  0x5e   : > { %v1158_v45 = vor.u32 %v1157_v57, %v1156_v27  ;;  %v1164_v27 = vrot.slane %v2946_v46, 1  ;;  %v1165_v57 = vrot.slane %v2884_v16, 2 }
  0x60   : > { %v1159_v22 = vsel %vm1144_vm4, %v1154_v51, %v1158_v45 }
  0x69   : > { %2587 = vmatmul.msk.bf16.vlgmr.msrb.gmra.mxu1 %vm458_vm2, %v2872_v12  ;;  %v766_v12 = vrot.slane %v2860_v8, 1 }
  0x6a   : > { %2606 = vmatmul.msk.bf16.vlgmr.msrb.gmra.mxu2 %vm458_vm2, %v759_v62  ;;  %v1161_v62 = vrot.slane %v2878_v14, 2 }
  0x6b   : > { %2644 = vmatmul.msk.bf16.vlgmr.msrb.gmra.mxu0 %vm458_vm2, %v1151_v61  ;;  %v767_v21 = vsel %vm756_vm3, %v764_v55, %v766_v12 }
  0x6c   : > { %2627 = vmatmul.msk.bf16.gmra.mxu3 %vm458_vm2, %v765_v2  ;;  %v1162_v61 = vor.u32 %v1161_v62, %v1160_v43 }
  0x79   : > { %2588 = vmatmul.msk.bf16.gmra.mxu1 %vm458_vm2, %v2875_v13  ;;  %v768_v13 = vrot.slane %v2863_v9, 1 }
  0x7a   : > { %2607 = vmatmul.msk.bf16.gmra.mxu2 %vm458_vm2, %v761_v20 }
  0x7b   : > { %2645 = vmatmul.msk.bf16.gmra.mxu0 %vm458_vm2, %v1155_v28  ;;  %v769_v20 = vsel %vm756_vm3, %v766_v12, %v768_v13 }
  0x7c   : > { %2628 = vmatmul.msk.bf16.gmra.mxu3 %vm458_vm2, %v767_v21 }
  0x89   : > { %2589 = vmatmul.msk.bf16.gmra.mxu1 %vm458_vm2, %v2938_v42  ;;  %v1163_v42 = vsel %vm1144_vm4, %v1158_v45, %v1162_v61  ;;  %v1166_v45 = vor.u32 %v1165_v57, %v1164_v27 }
  0x8a   : > { %2608 = vmatmul.msk.bf16.gmra.mxu2 %vm458_vm2, %v763_v4  ;;  %v770_v4 = vrot.slane %v2922_v37, 1 }
  0x8b   : > { %2646 = vmatmul.msk.bf16.gmra.mxu0 %vm458_vm2, %v1159_v22 }
  0x8c   : > { %2629 = vmatmul.msk.bf16.gmra.mxu3 %vm458_vm2, %v769_v20  ;;  %v771_v28 = vsel %vm756_vm3, %v768_v13, %v770_v4  ;;  %v772_v13 = vrot.slane %v2995_v5, 1 }
  0x8e   : > { %v773_v16 = vsel %vm756_vm3, %v770_v4, %v772_v13  ;;  %v774_v4 = vrot.slane %v2975_v60, 1 }
  0x96   : > { %v3172_v55 = vpop.f32.mrf.mxu1 }
  0x98   : > { %v3174_v35 = vpop.f32.mrf.mxu0 }
  0x99   : > { %2590 = vmatmul.msk.bf16.gmra.mxu1 %vm458_vm2, %v3008_v26 }
  0x9a   : > { %2609 = vmatmul.msk.bf16.gmra.mxu2 %vm458_vm2, %v765_v2 }
  0x9b   : > { %2647 = vmatmul.msk.bf16.gmra.mxu0 %vm458_vm2, %v1163_v42  ;;  %v1167_v42 = vsel %vm1144_vm4, %v1162_v61, %v1166_v45  ;;  %v1168_v61 = vrot.slane %v3015_v29, 1 }
  0x9c   : > { %2630 = vmatmul.msk.bf16.gmra.mxu3 %vm458_vm2, %v771_v28 }
  0x9d   : > { %v3182_v58 = vpop.f32.mrf.mxu2 }
  0x9e   : > { %3930 = vst [vmem:[#allocation23_spill] sm:$0xff] %v3182_v58  ;;  %v3184_v51 = vpop.f32.mrf.mxu1 }
  0x9f   : > { %v3194_v22 = vpop.f32.mrf.mxu3 }
  0xa0   : > { %v3187_v12 = vpop.f32.mrf.mxu0  ;;  %3932 = vst [vmem:[#allocation25_spill] sm:$0xff] %v3194_v22 }
  0xa5   : > { %v3192_v2 = vpop.f32.mrf.mxu2 }
  0xa6   : > { %3931 = vst [vmem:[#allocation24_spill] sm:$0xff] %v3192_v2  ;;  %v3196_v43 = vpop.f32.mrf.mxu1  ;;  %v1169_v2 = vrot.slane %v2949_v47, 2  ;;  %v775_v47 = vsel %vm756_vm3, %v772_v13, %v774_v4  ;;  %v776_v13 = vrot.slane %v2866_v10, 1 }
  0xa7   : > { %v3208_v57 = vpop.f32.mrf.mxu3 }
  0xa8   : > { %v3198_v62 = vpop.f32.mrf.mxu0  ;;  %3934 = vst [vmem:[#allocation27_spill] sm:$0xff] %v3208_v57 }
  0xa9   : > { %2591 = vmatmul.msk.bf16.gmra.mxu1 %vm458_vm2, %v3028_v36 }
  0xaa   : > { %2610 = vmatmul.msk.bf16.gmra.mxu2 %vm458_vm2, %v767_v21  ;;  %v1170_v21 = vor.u32 %v1169_v2, %v1168_v61 }
  0xab   : > { %2648 = vmatmul.msk.bf16.gmra.mxu0 %vm458_vm2, %v1167_v42 }
  0xac   : > { %2631 = vmatmul.msk.bf16.gmra.mxu3 %vm458_vm2, %v773_v16  ;;  %v1171_v58 = vsel %vm1144_vm4, %v1166_v45, %v1170_v21  ;;  %v1172_v45 = vrot.slane %v3077_v63, 1 }
  0xad   : > { %v3206_v27 = vpop.f32.mrf.mxu2 }
  0xae   : > { %3933 = vst [vmem:[#allocation26_spill] sm:$0xff] %v3206_v27  ;;  %v3210_v22 = vpop.f32.mrf.mxu1 }
  0xaf   : > { %v3220_v36 = vpop.f32.mrf.mxu3 }
  0xb0   : > { %v3213_v46 = vpop.f32.mrf.mxu0  ;;  %3936 = vst [vmem:[#allocation29_spill] sm:$0xff] %v3220_v36 }
  0xb5   : > { %v3218_v42 = vpop.f32.mrf.mxu2 }
  0xb6   : > { %3935 = vst [vmem:[#allocation28_spill] sm:$0xff] %v3218_v42  ;;  %v3222_v27 = vpop.f32.mrf.mxu1 }
  0xb7   : > { %v3234_v61 = vpop.f32.mrf.mxu3 }
  0xb8   : > { %v3224_v57 = vpop.f32.mrf.mxu0  ;;  %3938 = vst [vmem:[#allocation31_spill] sm:$0xff] %v3234_v61 }
  0xb9   : > { %2592 = vmatmul.msk.bf16.gmra.mxu1 %vm458_vm2, %v2860_v8  ;;  %v1173_v8 = vrot.slane %v3018_v30, 2  ;;  %v777_v30 = vsel %vm756_vm3, %v774_v4, %v776_v13  ;;  %v778_v4 = vrot.slane %v2869_v11, 1 }
  0xba   : > { %2611 = vmatmul.msk.bf16.gmra.mxu2 %vm458_vm2, %v769_v20 }
  0xbb   : > { %2649 = vmatmul.msk.bf16.gmra.mxu0 %vm458_vm2, %v1171_v58  ;;  %v1174_v20 = vor.u32 %v1173_v8, %v1172_v45 }
  0xbc   : > { %2632 = vmatmul.msk.bf16.gmra.mxu3 %vm458_vm2, %v775_v47 }
  0xbd   : > { %v3232_v2 = vpop.f32.mrf.mxu2  ;;  %v1175_v14 = vsel %vm1144_vm4, %v1170_v21, %v1174_v20  ;;  %v1176_v21 = vrot.slane %v3005_v23, 1  ;;  %v3287_v23 = vsel %vm756_vm3, %v776_v13, %v778_v4  ;;  %v780_v13 = vrot.slane %v2926_v38, 1 }
  0xbe   : > { %3937 = vst [vmem:[#allocation30_spill] sm:$0xff] %v3232_v2  ;;  %v3236_v36 = vpop.f32.mrf.mxu1 }
  0xbf   : > { %v3246_v42 = vpop.f32.mrf.mxu3  ;;  %v3305_v24 = vsel %vm756_vm3, %v778_v4, %v780_v13 }
  0xc0   : > { %v3239_v29 = vpop.f32.mrf.mxu0  ;;  %3940 = vst [vmem:[#allocation33_spill] sm:$0xff] %v3246_v42 }
  0xc5   : > { %v3244_v58 = vpop.f32.mrf.mxu2 }
  0xc6   : > { %3939 = vst [vmem:[#allocation32_spill] sm:$0xff] %v3244_v58  ;;  %v3248_v2 = vpop.f32.mrf.mxu1 }
  0xc7   : > { %3941 = vst [vmem:[#allocation34_spill] sm:$0xff] %v3248_v2  ;;  %v3260_v8 = vpop.f32.mrf.mxu3 }
  0xc8   : > { %v3250_v61 = vpop.f32.mrf.mxu0  ;;  %3943 = vst [vmem:[#allocation36_spill] sm:$0xff] %v3260_v8 }
  0xc9   : > { %2593 = vmatmul.msk.bf16.gmra.mxu1 %vm458_vm2, %v2863_v9  ;;  %v1177_v9 = vrot.slane %v2989_v3, 2 }
  0xca   : > { %2612 = vmatmul.msk.bf16.gmra.mxu2 %vm458_vm2, %v771_v28 }
  0xcb   : > { %2650 = vmatmul.msk.bf16.gmra.mxu0 %vm458_vm2, %v1175_v14  ;;  %v1178_v28 = vor.u32 %v1177_v9, %v1176_v21 }
  0xcc   : > { %2633 = vmatmul.msk.bf16.gmra.mxu3 %vm458_vm2, %v777_v30 }
  0xcd   : > { %v3258_v45 = vpop.f32.mrf.mxu2  ;;  %v1179_v8 = vsel %vm1144_vm4, %v1174_v20, %v1178_v28  ;;  %v1180_v20 = vrot.slane %v2890_v18, 1 }
  0xce   : > { %3942 = vst [vmem:[#allocation35_spill] sm:$0xff] %v3258_v45  ;;  %v3262_v42 = vpop.f32.mrf.mxu1 }
  0xcf   : > { %3944 = vst [vmem:[#allocation37_spill] sm:$0xff] %v3262_v42  ;;  %v1016_v58 = vpop.f32.mrf.mxu3  ;;  %v1184_v42 = vrot.slane %v2952_v48, 1 }
  0xd0   : > { %v3265_v63 = vpop.f32.mrf.mxu0 }
  0xd5   : > { %v3270_v14 = vpop.f32.mrf.mxu2 }
  0xd6   : > { %3945 = vst [vmem:[#allocation38_spill] sm:$0xff] %v3270_v14  ;;  %v3272_v15 = vpop.f32.mrf.mxu1 }
  0xd7   : > { %3946 = vst [vmem:[#allocation39_spill] sm:$0xff] %v3272_v15  ;;  %v1018_v21 = vpop.f32.mrf.mxu3 }
  0xd8   : > { %v3274_v45 = vpop.f32.mrf.mxu0 }
  0xd9   : > { %2594 = vmatmul.msk.bf16.gmra.mxu1 %vm458_vm2, %v2922_v37  ;;  %v1181_v37 = vrot.slane %v2887_v17, 2 }
  0xda   : > { %2613 = vmatmul.msk.bf16.gmra.mxu2 %vm458_vm2, %v773_v16 }
  0xdb   : > { %2651 = vmatmul.msk.bf16.gmra.mxu0 %vm458_vm2, %v1179_v8  ;;  %v1182_v16 = vor.u32 %v1181_v37, %v1180_v20 }
  0xdc   : > { %2634 = vmatmul.msk.bf16.gmra.mxu3 %vm458_vm2, %v3287_v23 }
  0xdd   : > { %v3282_v3 = vpop.f32.mrf.mxu2 }
  0xde   : > { %3947 = vst [vmem:[#allocation40_spill] sm:$0xff] %v3282_v3  ;;  %v3284_v9 = vpop.f32.mrf.mxu1 }
  0xdf   : > { %3948 = vst [vmem:[#allocation41_spill] sm:$0xff] %v3284_v9  ;;  %v1021_v26 = vpop.f32.mrf.mxu3  ;;  %v1183_v9 = vsel %vm1144_vm4, %v1178_v28, %v1182_v16 }
  0xe0   : > { %v3289_v14 = vpop.f32.mrf.mxu0 }
  0xe5   : > { %v3295_v8 = vpop.f32.mrf.mxu2 }
  0xe6   : > { %3949 = vst [vmem:[#allocation42_spill] sm:$0xff] %v3295_v8  ;;  %v664_v3 = vpop.f32.mrf.mxu1 }
  0xe7   : > { %v665_v17 = vadd.f32 %v664_v3, %v3174_v35  ;;  %v1023_v20 = vpop.f32.mrf.mxu3 }
  0xe8   : > { %v1296_v15 = vpop.f32.mrf.mxu0 }
  0xe9   : > { %2595 = vmatmul.msk.bf16.gmra.mxu1 %vm458_vm2, %v2995_v5  ;;  %v1185_v5 = vrot.slane %v2893_v19, 2 }
  0xea   : > { %2614 = vmatmul.msk.bf16.gmra.mxu2 %vm458_vm2, %v775_v47 }
  0xeb   : > { %2652 = vmatmul.msk.bf16.gmra.mxu0 %vm458_vm2, %v1183_v9  ;;  %v1186_v35 = vor.u32 %v1185_v5, %v1184_v42 }
  0xec   : > { %2635 = vmatmul.msk.bf16.gmra.mxu3 %vm458_vm2, %v3305_v24 }
  0xed   : > { %v860_v18 = vpop.f32.mrf.mxu2 }
  0xee   : > { %v950_v37 = vadd.f32 %v860_v18, %v665_v17  ;;  %v666_v8 = vpop.f32.mrf.mxu1 }
  0xef   : > { %v667_v3 = vadd.f32 %v666_v8, %v3187_v12  ;;  %v1026_v17 = vpop.f32.mrf.mxu3 }
  0xf0   : > { %v1106_v25 = vadd.f32 %v1016_v58, %v950_v37  ;;  %v1298_v28 = vpop.f32.mrf.mxu0  ;;  %v1187_v58 = vsel %vm1144_vm4, %v1182_v16, %v1186_v35 }
  0xf2   : > { %v3311_v47 = vadd.f32 %v1296_v15, %v1106_v25  ;;  %v782_v15 = vrot.slane %v2998_v6, 1 }
  0xf4   : > { %v3324_v5 = vsel %vm756_vm3, %v780_v13, %v782_v15 }
  0xf5   : > { %v862_v9 = vpop.f32.mrf.mxu2 }
  0xf6   : > { %v951_v18 = vadd.f32 %v862_v9, %v667_v3  ;;  %v669_v2 = vpop.f32.mrf.mxu1 }
  0xf7   : > { %v670_v25 = vadd.f32 %v669_v2, %v3198_v62  ;;  %v1028_v42 = vpop.f32.mrf.mxu3 }
  0xf8   : > { %v1107_v4 = vadd.f32 %v1018_v21, %v951_v18  ;;  %v1301_v53 = vpop.f32.mrf.mxu0 }
  0xf9   : > { %2596 = vmatmul.msk.bf16.gmra.mxu1 %vm458_vm2, %v2975_v60  ;;  %v1188_v60 = vrot.slane %v3021_v33, 1 }
  0xfa   : > { %2615 = vmatmul.msk.bf16.gmra.mxu2 %vm458_vm2, %v777_v30  ;;  %v3318_v37 = vadd.f32 %v1298_v28, %v1107_v4  ;;  %v1189_v30 = vrot.slane %v2955_v49, 2 }
  0xfb   : > { %2653 = vmatmul.msk.bf16.gmra.mxu0 %vm458_vm2, %v1187_v58 }
  0xfc   : > { %2636 = vmatmul.msk.bf16.gmra.mxu3 %vm458_vm2, %v3324_v5  ;;  %v1190_v2 = vor.u32 %v1189_v30, %v1188_v60  ;;  %v1192_v30 = vrot.slane %v3080_v0, 1 }
  0xfd   : > { %v865_v12 = vpop.f32.mrf.mxu2 }
  0xfe   : > { %v952_v8 = vadd.f32 %v865_v12, %v670_v25  ;;  %v671_v21 = vpop.f32.mrf.mxu1 }
  0xff   : > { %v672_v62 = vadd.f32 %v671_v21, %v3213_v46  ;;  %v1031_v18 = vpop.f32.mrf.mxu3  ;;  %v784_v46 = vrot.slane %v3070_v54, 1 }
 0x100   : > { %v1108_v16 = vadd.f32 %v1021_v26, %v952_v8  ;;  %v1303_v3 = vpop.f32.mrf.mxu0  ;;  %v1191_v26 = vsel %vm1144_vm4, %v1186_v35, %v1190_v2 }
 0x101   : > { %v3344_v35 = vsel %vm756_vm3, %v782_v15, %v784_v46 }
 0x102   : > { %v3330_v28 = vadd.f32 %v1301_v53, %v1108_v16 }
 0x105   : > { %v867_v9 = vpop.f32.mrf.mxu2 }
 0x106   : > { %v953_v4 = vadd.f32 %v867_v9, %v672_v62  ;;  %v674_v58 = vpop.f32.mrf.mxu1 }
 0x107   : > { %v675_v53 = vadd.f32 %v674_v58, %v3224_v57  ;;  %v1033_v21 = vpop.f32.mrf.mxu3 }
 0x108   : > { %v1109_v13 = vadd.f32 %v1023_v20, %v953_v4  ;;  %v1306_v25 = vpop.f32.mrf.mxu0 }
 0x109   : > { %2597 = vmatmul.msk.bf16.gmra.mxu1 %vm458_vm2, %v2866_v10 }
 0x10a   : > { %2616 = vmatmul.msk.bf16.gmra.mxu2 %vm458_vm2, %v3287_v23  ;;  %v3338_v12 = vadd.f32 %v1303_v3, %v1109_v13  ;;  %v1193_v23 = vrot.slane %v3024_v34, 2 }
 0x10b   : > { %2654 = vmatmul.msk.bf16.gmra.mxu0 %vm458_vm2, %v1191_v26 }
 0x10c   : > { %2637 = vmatmul.msk.bf16.gmra.mxu3 %vm458_vm2, %v3344_v35  ;;  %v1194_v62 = vor.u32 %v1193_v23, %v1192_v30  ;;  %v1196_v30 = vrot.slane %v3119_v7, 1 }
 0x10d   : > { %v870_v8 = vpop.f32.mrf.mxu2 }
 0x10e   : > { %v954_v20 = vadd.f32 %v870_v8, %v675_v53  ;;  %v676_v16 = vpop.f32.mrf.mxu1 }
 0x10f   : > { %v677_v57 = vadd.f32 %v676_v16, %v3239_v29  ;;  %v1036_v4 = vpop.f32.mrf.mxu3  ;;  %v786_v29 = vrot.slane %v2911_v31, 1 }
 0x110   : > { %v1110_v60 = vadd.f32 %v1026_v17, %v954_v20  ;;  %v1308_v10 = vpop.f32.mrf.mxu0  ;;  %v1195_v17 = vsel %vm1144_vm4, %v1190_v2, %v1194_v62 }
 0x111   : > { %v3364_v2 = vsel %vm756_vm3, %v784_v46, %v786_v29 }
 0x112   : > { %v3350_v3 = vadd.f32 %v1306_v25, %v1110_v60 }
 0x115   : > { %v872_v9 = vpop.f32.mrf.mxu2 }
 0x116   : > { %v955_v58 = vadd.f32 %v872_v9, %v677_v57  ;;  %v679_v13 = vpop.f32.mrf.mxu1 }
 0x117   : > { %v680_v25 = vadd.f32 %v679_v13, %v3250_v61  ;;  %v1038_v20 = vpop.f32.mrf.mxu3 }
 0x118   : > { %v1111_v15 = vadd.f32 %v1028_v42, %v955_v58  ;;  %v1311_v26 = vpop.f32.mrf.mxu0 }
 0x119   : > { %2598 = vmatmul.msk.bf16.gmra.mxu1 %vm458_vm2, %v2869_v11 }
 0x11a   : > { %2617 = vmatmul.msk.bf16.gmra.mxu2 %vm458_vm2, %v3305_v24  ;;  %v3358_v53 = vadd.f32 %v1308_v10, %v1111_v15  ;;  %v1197_v24 = vrot.slane %v3083_v56, 2 }
 0x11b   : > { %2655 = vmatmul.msk.bf16.gmra.mxu0 %vm458_vm2, %v1195_v17 }
 0x11c   : > { %2638 = vmatmul.msk.bf16.gmra.mxu3 %vm458_vm2, %v3364_v2  ;;  %v1198_v23 = vor.u32 %v1197_v24, %v1196_v30 }
 0x11d   : > { %v875_v8 = vpop.f32.mrf.mxu2 }
 0x11e   : > { %v956_v42 = vadd.f32 %v875_v8, %v680_v25  ;;  %v681_v16 = vpop.f32.mrf.mxu1 }
 0x11f   : > { %v682_v61 = vadd.f32 %v681_v16, %v3265_v63  ;;  %v1041_v9 = vpop.f32.mrf.mxu3  ;;  %v788_v63 = vrot.slane %v2914_v32, 1 }
 0x120   : > { %v1112_v60 = vadd.f32 %v1031_v18, %v956_v42  ;;  %v1313_v11 = vpop.f32.mrf.mxu0  ;;  %v1199_v18 = vsel %vm1144_vm4, %v1194_v62, %v1198_v23 }
 0x121   : > { %v3384_v62 = vsel %vm756_vm3, %v786_v29, %v788_v63 }
 0x122   : > { %v3370_v10 = vadd.f32 %v1311_v26, %v1112_v60  ;;  %v1200_v60 = vrot.slane %v2932_v40, 1 }
 0x125   : > { %v877_v57 = vpop.f32.mrf.mxu2 }
 0x126   : > { %v957_v58 = vadd.f32 %v877_v57, %v682_v61  ;;  %v684_v13 = vpop.f32.mrf.mxu1 }
 0x127   : > { %v685_v26 = vadd.f32 %v684_v13, %v3274_v45  ;;  %v1043_v8 = vpop.f32.mrf.mxu3 }
 0x128   : > { %v1113_v46 = vadd.f32 %v1033_v21, %v957_v58  ;;  %v1316_v15 = vpop.f32.mrf.mxu0 }
 0x129   : > { %2599 = vmatmul.msk.bf16.gmra.mxu1 %vm458_vm2, %v2926_v38 }
 0x12a   : > { %2618 = vmatmul.msk.bf16.gmra.mxu2 %vm458_vm2, %v3324_v5  ;;  %v3378_v17 = vadd.f32 %v1313_v11, %v1113_v46  ;;  %v1201_v5 = vrot.slane %v2929_v39, 2 }
 0x12b   : > { %2656 = vmatmul.msk.bf16.gmra.mxu0 %vm458_vm2, %v1199_v18 }
 0x12c   : > { %2639 = vmatmul.msk.bf16.gmra.mxu3 %vm458_vm2, %v3384_v62  ;;  %v1202_v30 = vor.u32 %v1201_v5, %v1200_v60 }
 0x12d   : > { %v880_v25 = vpop.f32.mrf.mxu2 }
 0x12e   : > { %v958_v21 = vadd.f32 %v880_v25, %v685_v26  ;;  %v686_v42 = vpop.f32.mrf.mxu1 }
 0x12f   : > { %v687_v45 = vadd.f32 %v686_v42, %v3289_v14  ;;  %v1046_v61 = vpop.f32.mrf.mxu3  ;;  %v3402_v14 = vrot.slane %v2972_v59, 1  ;;  %v1205_v42 = vrot.slane %v2935_v41, 2 }
 0x130   : > { %v1114_v16 = vadd.f32 %v1036_v4, %v958_v21  ;;  %v1318_v38 = vpop.f32.mrf.mxu0  ;;  %v1203_v4 = vsel %vm1144_vm4, %v1198_v23, %v1202_v30 }
 0x131   : > { %v3407_v23 = vsel %vm756_vm3, %v788_v63, %v3402_v14 }
 0x132   : > { %v3390_v11 = vadd.f32 %v1316_v15, %v1114_v16 }
 0x135   : > { %v882_v24 = vpop.f32.mrf.mxu2 }
 0x136   : > { %v959_v57 = vadd.f32 %v882_v24, %v687_v45  ;;  %v689_v58 = vpop.f32.mrf.mxu1 }
 0x137   : > { %v690_v15 = vadd.f32 %v689_v58, %v3172_v55 }
 0x138   : > { %v1115_v29 = vadd.f32 %v1038_v20, %v959_v57  ;;  %v1321_v13 = vpop.f32.mrf.mxu0  ;;  %v1048_v20 = vpop.f32.mrf.mxu3 }
 0x139   : > { %2600 = vmatmul.msk.bf16.gmra.mxu1 %vm458_vm2, %v2998_v6 }
 0x13a   : > { %2619 = vmatmul.msk.bf16.gmra.mxu2 %vm458_vm2, %v3344_v35  ;;  %v3398_v46 = vadd.f32 %v1318_v38, %v1115_v29  ;;  %v1204_v35 = vrot.slane %v2983_v1, 1 }
 0x13b   : > { %2657 = vmatmul.msk.bf16.gmra.mxu0 %vm458_vm2, %v1203_v4 }
 0x13c   : > { %2640 = vmatmul.msk.bf16.gmra.mxu3 %vm458_vm2, %v3407_v23  ;;  %v1206_v38 = vor.u32 %v1205_v42, %v1204_v35  ;;  %v2767_v35 = vld [vmem:[%s2857_s25 + $0x98] sm:$0xff]  }
 0x13d   : > { %v885_v18 = vpop.f32.mrf.mxu2 }
 0x13e   : > { %v960_v26 = vadd.f32 %v885_v18, %v690_v15  ;;  %v691_v25 = vpop.f32.mrf.mxu1 }
 0x13f   : > { %v692_v55 = vadd.f32 %v691_v25, %v3184_v51  ;;  %v3950_v51 = vld [vmem:[#allocation13_spill] sm:$0xff]  ;;  %v3951_v25 = vld [vmem:[#allocation20_spill] sm:$0xff] }
 0x140   : > { %v1116_v6 = vadd.f32 %v1041_v9, %v960_v26  ;;  %v1323_v21 = vpop.f32.mrf.mxu0  ;;  %v1051_v5 = vpop.f32.mrf.mxu3  ;;  %v1207_v9 = vsel %vm1144_vm4, %v1202_v30, %v1206_v38  ;;  %v994_v29 = vrot.slane %v3950_v51, 1 }
 0x142   : > { %v3413_v16 = vadd.f32 %v1321_v13, %v1116_v6  ;;  %v995_v30 = vsel %vm756_vm3, %v3402_v14, %v994_v29  ;;  %v1208_v6 = vrot.slane %v3951_v25, 1 }
 0x145   : > { %v887_v60 = vpop.f32.mrf.mxu2 }
 0x146   : > { %v961_v45 = vadd.f32 %v887_v60, %v692_v55  ;;  %v694_v24 = vpop.f32.mrf.mxu1  ;;  %v2764_v55 = vunpack.c.l.b16 %v2767_v35 }
 0x147   : > { %v695_v13 = vadd.f32 %v694_v24, %v3196_v43 }
 0x148   : > { %v1117_v63 = vadd.f32 %v1043_v8, %v961_v45  ;;  %v1326_v57 = vpop.f32.mrf.mxu0  ;;  %v1053_v8 = vpop.f32.mrf.mxu3 }
 0x149   : > { %2601 = vmatmul.msk.bf16.gmra.mxu1 %vm458_vm2, %v3070_v54 }
 0x14a   : > { %2620 = vmatmul.msk.bf16.gmra.mxu2 %vm458_vm2, %v3364_v2  ;;  %v3421_v58 = vadd.f32 %v1323_v21, %v1117_v63  ;;  %v3952_v2 = vld [vmem:[#allocation9_spill] sm:$0xff] }
 0x14b   : > { %2658 = vmatmul.msk.bf16.gmra.mxu0 %vm458_vm2, %v1207_v9  ;;  %v1209_v21 = vrot.slane %v3952_v2, 2 }
 0x14c   : > { %2641 = vmatmul.msk.bf16.gmra.mxu3 %vm458_vm2, %v995_v30  ;;  %v3905_v30 = vshrl.u32 %v3950_v51, 16 }
 0x14d   : > { %v890_v4 = vpop.f32.mrf.mxu2  ;;  %v1210_v60 = vor.u32 %v1209_v21, %v1208_v6 }
 0x14e   : > { %v962_v15 = vadd.f32 %v890_v4, %v695_v13  ;;  %v696_v18 = vpop.f32.mrf.mxu1  ;;  %v3435_v13 = vpack.c.b16 %v2764_v55, %v2764_v55 }
 0x14f   : > { %v697_v43 = vadd.f32 %v696_v18, %v3210_v22 }
 0x150   : > { %v1118_v26 = vadd.f32 %v1046_v61, %v962_v15  ;;  %v1328_v54 = vpop.f32.mrf.mxu0  ;;  %v1056_v24 = vpop.f32.mrf.mxu3  ;;  %v1211_v15 = vsel %vm1144_vm4, %v1206_v38, %v1210_v60  ;;  %v996_v22 = vrot.slane %v3435_v13, 1 }
 0x152   : > { %v3432_v42 = vadd.f32 %v1326_v57, %v1118_v26 }
 0x155   : > { %v892_v45 = vpop.f32.mrf.mxu2 }
 0x156   : > { %v963_v63 = vadd.f32 %v892_v45, %v697_v43  ;;  %v699_v9 = vpop.f32.mrf.mxu1 }
 0x157   : > { %v700_v18 = vadd.f32 %v699_v9, %v3222_v27 }
 0x158   : > { %v1119_v61 = vadd.f32 %v1048_v20, %v963_v63  ;;  %v1331_v4 = vpop.f32.mrf.mxu0  ;;  %v3904_v20 = vshll.u32 %v3950_v51, 16  ;;  %v1058_v38 = vpop.f32.mrf.mxu3 }
 0x159   : > { %2602 = vmatmul.msk.bf16.gmra.mxu1 %vm458_vm2, %v2911_v31  ;;  %v997_v31 = vsel %vm756_vm3, %v994_v29, %v996_v22  ;;  %v1814_v29 = vrot.slane %v2962_v52, 3  ;;  %v1816_v22 = vrot.slane %v3087_v44, 2 }
 0x15a   : > { %2621 = vmatmul.msk.bf16.gmra.mxu2 %vm458_vm2, %v3384_v62  ;;  %v3442_v57 = vadd.f32 %v1328_v54, %v1119_v61  ;;  %v1215_v54 = vrot.slane %v3905_v30, 1  ;;  %v1218_v55 = vrot.slane %v3904_v20, 2 }
 0x15b   : > { %2659 = vmatmul.msk.bf16.gmra.mxu0 %vm458_vm2, %v1211_v15 }
 0x15c   : > { %2642 = vmatmul.msk.bf16.gmra.mxu3 %vm458_vm2, %v997_v31  ;;  %v1219_v45 = vor.u32 %v1218_v55, %v1215_v54  ;;  %v1222_v31 = vshrl.u32 %v3435_v13, 16 }
 0x15d   : > { %v895_v26 = vpop.f32.mrf.mxu2 }
 0x15e   : > { %v964_v6 = vadd.f32 %v895_v26, %v700_v18  ;;  %v701_v21 = vpop.f32.mrf.mxu1  ;;  %v3953_v18 = vld [vmem:[#allocation17_spill] sm:$0xff] }
 0x15f   : > { %v702_v43 = vadd.f32 %v701_v21, %v3236_v36  ;;  %v1817_v26 = vrot.slane %v3953_v18, 3  ;;  %v3954_v21 = vld [vmem:[#allocation34_spill] sm:$0xff] }
 0x160   : > { %v1120_v35 = vadd.f32 %v1051_v5, %v964_v6  ;;  %v1333_v62 = vpop.f32.mrf.mxu0  ;;  %v1061_v9 = vpop.f32.mrf.mxu3  ;;  %v1813_v5 = vrot.slane %v3037_v50, 2 }
 0x161   : > { %v1818_v52 = vor.u32 %v1817_v26, %v1816_v22 }
 0x162   : > { %v3455_v27 = vadd.f32 %v1331_v4, %v1120_v35  ;;  %v1220_v4 = vsel %vm1144_vm4, %v1210_v60, %v1219_v45  ;;  %v1815_v50 = vor.u32 %v1814_v29, %v1813_v5  ;;  %v3956_v29 = vld [vmem:[#allocation37_spill] sm:$0xff] }
 0x164   : > { %v1819_v55 = vsel %vm1812_vm5, %v1815_v50, %v1818_v52 }
 0x165   : > { %v897_v63 = vpop.f32.mrf.mxu2 }
 0x166   : > { %v965_v61 = vadd.f32 %v897_v63, %v702_v43  ;;  %v704_v15 = vpop.f32.mrf.mxu1  ;;  %v1224_v43 = vrot.slane %v1222_v31, 1  ;;  %v3958_v31 = vld [vmem:[#allocation18_spill] sm:$0xff] }
 0x167   : > { %v705_v44 = vadd.f32 %v704_v15, %v3954_v21  ;;  %v3955_v15 = vld [vmem:[#allocation19_spill] sm:$0xff] }
 0x168   : > { %v1121_v6 = vadd.f32 %v1053_v8, %v965_v61  ;;  %v1336_v20 = vpop.f32.mrf.mxu0  ;;  %v1225_v8 = vshll.u32 %v3435_v13, 16  ;;  %v1063_v35 = vpop.f32.mrf.mxu3  ;;  %v792_v5 = vrot.slane %v3955_v15, 1 }
 0x169   : > { %2603 = vmatmul.msk.bf16.gmra.mxu1 %vm458_vm2, %v2914_v32 }
 0x16a   : > { %2622 = vmatmul.msk.bf16.gmra.mxu2 %vm458_vm2, %v3407_v23  ;;  %v3467_v36 = vadd.f32 %v1333_v62, %v1121_v6  ;;  %v1227_v63 = vrot.slane %v1225_v8, 2  ;;  %v793_v50 = vsel %vm756_vm3, %v3402_v14, %v792_v5  ;;  %v1821_v8 = vrot.slane %v3958_v31, 3 }
 0x16b   : > { %2660 = vmatmul.msk.bf16.gmra.mxu0 %vm458_vm2, %v1220_v4 }
 0x16c   : > { %2701 = vmatmul.msk.bf16.vlgmr.msra.gmra.mxu3 %vm458_vm2, %v1819_v55  ;;  %v1228_v18 = vor.u32 %v1227_v63, %v1224_v43  ;;  %v3959_v55 = vld [vmem:[#allocation39_spill] sm:$0xff] }
 0x16d   : > { %v900_v60 = vpop.f32.mrf.mxu2 }
 0x16e   : > { %v966_v54 = vadd.f32 %v900_v60, %v705_v44  ;;  %v706_v32 = vpop.f32.mrf.mxu1 }
 0x16f   : > { %v707_v22 = vadd.f32 %v706_v32, %v3956_v29 }
 0x170   : > { %v1122_v23 = vadd.f32 %v1056_v24, %v966_v54  ;;  %v1338_v62 = vpop.f32.mrf.mxu0  ;;  %v1066_v6 = vpop.f32.mrf.mxu3  ;;  %v3957_v24 = vld [vmem:[#allocation21_spill] sm:$0xff] }
 0x171   : > { %v1820_v44 = vrot.slane %v3957_v24, 2  ;;  %v3961_v24 = vld [vmem:[#allocation41_spill] sm:$0xff] }
 0x172   : > { %v3475_v61 = vadd.f32 %v1336_v20, %v1122_v23  ;;  %v1229_v20 = vsel %vm1144_vm4, %v1219_v45, %v1228_v18  ;;  %v2783_v18 = vld [vmem:[%s2857_s25 + $0x10] sm:$0xff] }
 0x173   : > { %v1822_v14 = vor.u32 %v1821_v8, %v1820_v44  ;;  %v2093_v44 = vrot.slane %v2783_v18, 3 }
 0x175   : > { %v902_v26 = vpop.f32.mrf.mxu2  ;;  %v1823_v45 = vsel %vm1812_vm5, %v1818_v52, %v1822_v14 }
 0x176   : > { %v967_v4 = vadd.f32 %v902_v26, %v707_v22  ;;  %v709_v21 = vpop.f32.mrf.mxu1  ;;  %v2782_v22 = vld [vmem:[%s2857_s25 + $0x8] sm:$0xff]  ;;  %v1426_v26 = vrot.slane %v2783_v18, 2 }
 0x177   : > { %v710_v23 = vadd.f32 %v709_v21, %v3959_v55  ;;  %v3962_v55 = vld [vmem:[#allocation3_spill] sm:$0xff] }
 0x178   : > { %v1123_v60 = vadd.f32 %v1058_v38, %v967_v4  ;;  %v1341_v54 = vpop.f32.mrf.mxu0  ;;  %v1068_v63 = vpop.f32.mrf.mxu3  ;;  %v3960_v4 = vld [vmem:[#allocation12_spill] sm:$0xff] }
 0x179   : > { %2604 = vmatmul.msk.bf16.gmra.mxu1 %vm458_vm2, %v2972_v59  ;;  %v2094_v31 = vrot.slane %v3960_v4, 3 }
 0x17a   : > { %2623 = vmatmul.msk.bf16.gmra.mxu2 %vm458_vm2, %v793_v50  ;;  %v3487_v32 = vadd.f32 %v1338_v62, %v1123_v60  ;;  %v1425_v62 = vrot.slane %v2782_v22, 2  ;;  %v1428_v50 = vrot.slane %v3960_v4, 2 }
 0x17b   : > { %2661 = vmatmul.msk.bf16.gmra.mxu0 %vm458_vm2, %v1229_v20 }
 0x17c   : > { %2702 = vmatmul.msk.bf16.gmra.mxu3 %vm458_vm2, %v1823_v45  ;;  %v1429_v20 = vsel %vm1424_vm6, %v1426_v26, %v1428_v50 }
 0x17d   : > { %v905_v43 = vpop.f32.mrf.mxu2 }
 0x17e   : > { %v968_v38 = vadd.f32 %v905_v43, %v710_v23  ;;  %v711_v15 = vpop.f32.mrf.mxu1  ;;  %v1824_v23 = vrot.slane %v3962_v55, 2  ;;  %v3963_v43 = vld [vmem:[#allocation2_spill] sm:$0xff] }
 0x17f   : > { %v712_v21 = vadd.f32 %v711_v15, %v3961_v24  ;;  %v2095_v15 = vsel %vm2092_vm7, %v2093_v44, %v2094_v31 }
 0x180   : > { %v1124_v5 = vadd.f32 %v1061_v9, %v968_v38  ;;  %v1343_v29 = vpop.f32.mrf.mxu0  ;;  %v1071_v9 = vpop.f32.mrf.mxu3  ;;  %v1825_v38 = vrot.slane %v3963_v43, 3  ;;  %v3968_v43 = vld [vmem:[#allocation24_spill] sm:$0xff] }
 0x182   : > { %v3493_v59 = vadd.f32 %v1341_v54, %v1124_v5  ;;  %v1427_v54 = vsel %vm1424_vm6, %v1425_v62, %v1426_v26  ;;  %v1826_v18 = vor.u32 %v1825_v38, %v1824_v23  ;;  %v3965_v62 = vld [vmem:[#allocation23_spill] sm:$0xff] }
 0x185   : > { %v907_v8 = vpop.f32.mrf.mxu2 }
 0x186   : > { %v969_v52 = vadd.f32 %v907_v8, %v712_v21  ;;  %v714_v60 = vpop.f32.mrf.mxu1 }
 0x187   : > { %v715_v4 = vadd.f32 %v714_v60, %v3965_v62 }
 0x188   : > { %v1125_v45 = vadd.f32 %v1063_v35, %v969_v52  ;;  %v1346_v5 = vpop.f32.mrf.mxu0  ;;  %v1073_v24 = vpop.f32.mrf.mxu3  ;;  %v1827_v35 = vsel %vm1812_vm5, %v1822_v14, %v1826_v18 }
 0x189   : > { %2663 = vmatmul.msk.bf16.vlgmr.msra.gmra.mxu1 %vm458_vm2, %v1427_v54  ;;  %v3967_v54 = vld [vmem:[#allocation16_spill] sm:$0xff] }
 0x18a   : > { %2682 = vmatmul.msk.bf16.vlgmr.msra.gmra.mxu2 %vm458_vm2, %v1429_v20  ;;  %v3507_v22 = vadd.f32 %v1343_v29, %v1125_v45  ;;  %v1430_v29 = vrot.slane %v3967_v54, 2  ;;  %v2096_v23 = vrot.slane %v3967_v54, 3  ;;  %v3972_v54 = vld [vmem:[#allocation26_spill] sm:$0xff] }
 0x18b   : > { %2720 = vmatmul.msk.bf16.vlgmr.msra.gmra.mxu0 %vm458_vm2, %v2095_v15 }
 0x18c   : > { %3964 = vst [vmem:[#allocation13_spill] sm:$0xff] %v3507_v22  ;;  %2703 = vmatmul.msk.bf16.gmra.mxu3 %vm458_vm2, %v1827_v35 }
 0x18d   : > { %v910_v26 = vpop.f32.mrf.mxu2 }
 0x18e   : > { %v970_v21 = vadd.f32 %v910_v26, %v715_v4  ;;  %v716_v8 = vpop.f32.mrf.mxu1  ;;  %v1431_v4 = vsel %vm1424_vm6, %v1428_v50, %v1430_v29  ;;  %v3969_v26 = vld [vmem:[#allocation7_spill] sm:$0xff] }
 0x18f   : > { %v717_v45 = vadd.f32 %v716_v8, %v3968_v43  ;;  %v1828_v14 = vrot.slane %v3969_v26, 2 }
 0x190   : > { %v1126_v52 = vadd.f32 %v1066_v6, %v970_v21  ;;  %v1348_v55 = vpop.f32.mrf.mxu0  ;;  %v1076_v60 = vpop.f32.mrf.mxu3  ;;  %v3970_v6 = vld [vmem:[#allocation4_spill] sm:$0xff] }
 0x191   : > { %v1829_v21 = vrot.slane %v3970_v6, 3  ;;  %v2784_v6 = vld [vmem:[%s2857_s25 + $0x28] sm:$0xff] }
 0x192   : > { %v3513_v44 = vadd.f32 %v1346_v5, %v1126_v52  ;;  %v2097_v5 = vsel %vm2092_vm7, %v2094_v31, %v2096_v23 }
 0x193   : > { %v1830_v52 = vor.u32 %v1829_v21, %v1828_v14 }
 0x194   : > { %3966 = vst [vmem:[#allocation20_spill] sm:$0xff] %v3513_v44 }
 0x195   : > { %v912_v38 = vpop.f32.mrf.mxu2 }
 0x196   : > { %v971_v15 = vadd.f32 %v912_v38, %v717_v45  ;;  %v719_v62 = vpop.f32.mrf.mxu1 }
 0x197   : > { %v720_v50 = vadd.f32 %v719_v62, %v3972_v54 }
 0x198   : > { %v1127_v30 = vadd.f32 %v1068_v63, %v971_v15  ;;  %v1351_v35 = vpop.f32.mrf.mxu0  ;;  %v1078_v45 = vpop.f32.mrf.mxu3  ;;  %v1831_v63 = vsel %vm1812_vm5, %v1826_v18, %v1830_v52  ;;  %v3976_v18 = vld [vmem:[#allocation8_spill] sm:$0xff] }
 0x199   : > { %2664 = vmatmul.msk.bf16.gmra.mxu1 %vm458_vm2, %v1429_v20 }
 0x19a   : > { %2683 = vmatmul.msk.bf16.gmra.mxu2 %vm458_vm2, %v1431_v4  ;;  %v3524_v8 = vadd.f32 %v1348_v55, %v1127_v30  ;;  %v1432_v30 = vrot.slane %v2784_v6, 2  ;;  %v3974_v55 = vld [vmem:[#allocation28_spill] sm:$0xff] }
 0x19b   : > { %2721 = vmatmul.msk.bf16.gmra.mxu0 %vm458_vm2, %v2097_v5  ;;  %v2098_v5 = vrot.slane %v2784_v6, 3 }
 0x19c   : > { %3971 = vst [vmem:[#allocation9_spill] sm:$0xff] %v3524_v8  ;;  %2704 = vmatmul.msk.bf16.gmra.mxu3 %vm458_vm2, %v1831_v63  ;;  %v3978_v63 = vld [vmem:[#allocation30_spill] sm:$0xff] }
 0x19d   : > { %v915_v43 = vpop.f32.mrf.mxu2 }
 0x19e   : > { %v972_v38 = vadd.f32 %v915_v43, %v720_v50  ;;  %v721_v26 = vpop.f32.mrf.mxu1  ;;  %v1433_v50 = vsel %vm1424_vm6, %v1430_v29, %v1432_v30  ;;  %v3975_v43 = vld [vmem:[#allocation14_spill] sm:$0xff] }
 0x19f   : > { %v722_v8 = vadd.f32 %v721_v26, %v3974_v55  ;;  %v1832_v44 = vrot.slane %v3975_v43, 2  ;;  %v2785_v43 = vld [vmem:[%s2857_s25 + $0x30] sm:$0xff] }
 0x1a0   : > { %v1128_v15 = vadd.f32 %v1071_v9, %v972_v38  ;;  %v1353_v31 = vpop.f32.mrf.mxu0  ;;  %v1081_v21 = vpop.f32.mrf.mxu3  ;;  %v1833_v9 = vrot.slane %v3976_v18, 3  ;;  %v3980_v18 = vld [vmem:[#allocation32_spill] sm:$0xff] }
 0x1a2   : > { %v3530_v20 = vadd.f32 %v1351_v35, %v1128_v15  ;;  %v2099_v35 = vsel %vm2092_vm7, %v2096_v23, %v2098_v5 }
 0x1a4   : > { %3973 = vst [vmem:[#allocation17_spill] sm:$0xff] %v3530_v20 }
 0x1a5   : > { %v917_v14 = vpop.f32.mrf.mxu2 }
 0x1a6   : > { %v973_v62 = vadd.f32 %v917_v14, %v722_v8  ;;  %v724_v54 = vpop.f32.mrf.mxu1  ;;  %v1834_v8 = vor.u32 %v1833_v9, %v1832_v44 }
 0x1a7   : > { %v725_v29 = vadd.f32 %v724_v54, %v3978_v63 }
 0x1a8   : > { %v1129_v38 = vadd.f32 %v1073_v24, %v973_v62  ;;  %v1356_v22 = vpop.f32.mrf.mxu0  ;;  %v1083_v6 = vpop.f32.mrf.mxu3  ;;  %v1835_v24 = vsel %vm1812_vm5, %v1830_v52, %v1834_v8  ;;  %v3982_v52 = vld [vmem:[#allocation15_spill] sm:$0xff] }
 0x1a9   : > { %2665 = vmatmul.msk.bf16.gmra.mxu1 %vm458_vm2, %v1431_v4 }
 0x1aa   : > { %2684 = vmatmul.msk.bf16.gmra.mxu2 %vm458_vm2, %v1433_v50  ;;  %v3540_v26 = vadd.f32 %v1353_v31, %v1129_v38  ;;  %v1434_v31 = vrot.slane %v2785_v43, 2 }
 0x1ab   : > { %2722 = vmatmul.msk.bf16.gmra.mxu0 %vm458_vm2, %v2099_v35  ;;  %v2100_v35 = vrot.slane %v2785_v43, 3 }
 0x1ac   : > { %3977 = vst [vmem:[#allocation34_spill] sm:$0xff] %v3540_v26  ;;  %2705 = vmatmul.msk.bf16.gmra.mxu3 %vm458_vm2, %v1835_v24 }
 0x1ad   : > { %v920_v15 = vpop.f32.mrf.mxu2 }
 0x1ae   : > { %v974_v55 = vadd.f32 %v920_v15, %v725_v29  ;;  %v726_v14 = vpop.f32.mrf.mxu1  ;;  %v1435_v29 = vsel %vm1424_vm6, %v1432_v30, %v1434_v31  ;;  %v3981_v15 = vld [vmem:[#allocation22_spill] sm:$0xff] }
 0x1af   : > { %v727_v38 = vadd.f32 %v726_v14, %v3980_v18  ;;  %v1836_v26 = vrot.slane %v3981_v15, 2  ;;  %v2786_v15 = vld [vmem:[%s2857_s25 + $0x38] sm:$0xff] }
 0x1b0   : > { %v1130_v62 = vadd.f32 %v1076_v60, %v974_v55  ;;  %v1358_v23 = vpop.f32.mrf.mxu0  ;;  %v1086_v9 = vpop.f32.mrf.mxu3  ;;  %v1837_v60 = vrot.slane %v3982_v52, 3  ;;  %v3986_v52 = vld [vmem:[#allocation38_spill] sm:$0xff] }
 0x1b2   : > { %v3546_v4 = vadd.f32 %v1356_v22, %v1130_v62  ;;  %v2101_v22 = vsel %vm2092_vm7, %v2098_v5, %v2100_v35  ;;  %v1838_v24 = vor.u32 %v1837_v60, %v1836_v26  ;;  %v3984_v62 = vld [vmem:[#allocation35_spill] sm:$0xff] }
 0x1b4   : > { %3979 = vst [vmem:[#allocation19_spill] sm:$0xff] %v3546_v4 }
 0x1b5   : > { %v922_v44 = vpop.f32.mrf.mxu2 }
 0x1b6   : > { %v975_v54 = vadd.f32 %v922_v44, %v727_v38  ;;  %v729_v63 = vpop.f32.mrf.mxu1 }
 0x1b7   : > { %v730_v30 = vadd.f32 %v729_v63, %v3984_v62 }
 0x1b8   : > { %v1131_v55 = vadd.f32 %v1078_v45, %v975_v54  ;;  %v1361_v20 = vpop.f32.mrf.mxu0  ;;  %v1088_v18 = vpop.f32.mrf.mxu3  ;;  %v1839_v45 = vsel %vm1812_vm5, %v1834_v8, %v1838_v24  ;;  %v3988_v8 = vld [vmem:[#allocation10_spill] sm:$0xff] }
 0x1b9   : > { %2666 = vmatmul.msk.bf16.gmra.mxu1 %vm458_vm2, %v1433_v50 }
 0x1ba   : > { %2685 = vmatmul.msk.bf16.gmra.mxu2 %vm458_vm2, %v1435_v29  ;;  %v3556_v14 = vadd.f32 %v1358_v23, %v1131_v55  ;;  %v1436_v23 = vrot.slane %v2786_v15, 2 }
 0x1bb   : > { %2723 = vmatmul.msk.bf16.gmra.mxu0 %vm458_vm2, %v2101_v22  ;;  %v2102_v22 = vrot.slane %v2786_v15, 3 }
 0x1bc   : > { %3983 = vst [vmem:[#allocation37_spill] sm:$0xff] %v3556_v14  ;;  %2706 = vmatmul.msk.bf16.gmra.mxu3 %vm458_vm2, %v1839_v45 }
 0x1bd   : > { %v925_v43 = vpop.f32.mrf.mxu2 }
 0x1be   : > { %v976_v38 = vadd.f32 %v925_v43, %v730_v30  ;;  %v731_v44 = vpop.f32.mrf.mxu1  ;;  %v1437_v30 = vsel %vm1424_vm6, %v1434_v31, %v1436_v23  ;;  %v3987_v43 = vld [vmem:[#allocation11_spill] sm:$0xff] }
 0x1bf   : > { %v732_v55 = vadd.f32 %v731_v44, %v3986_v52  ;;  %v1840_v14 = vrot.slane %v3987_v43, 2  ;;  %v2787_v43 = vld [vmem:[%s2857_s25 + $0x40] sm:$0xff] }
 0x1c0   : > { %v1132_v54 = vadd.f32 %v1081_v21, %v976_v38  ;;  %v1363_v5 = vpop.f32.mrf.mxu0  ;;  %v1091_v60 = vpop.f32.mrf.mxu3  ;;  %v1841_v21 = vrot.slane %v3988_v8, 3  ;;  %v3991_v8 = vld [vmem:[#allocation42_spill] sm:$0xff] }
 0x1c2   : > { %v3562_v50 = vadd.f32 %v1361_v20, %v1132_v54  ;;  %v2103_v20 = vsel %vm2092_vm7, %v2100_v35, %v2102_v22  ;;  %v1842_v45 = vor.u32 %v1841_v21, %v1840_v14  ;;  %v3990_v54 = vld [vmem:[#allocation40_spill] sm:$0xff] }
 0x1c4   : > { %3985 = vst [vmem:[#allocation21_spill] sm:$0xff] %v3562_v50 }
 0x1c5   : > { %v927_v26 = vpop.f32.mrf.mxu2 }
 0x1c6   : > { %v977_v63 = vadd.f32 %v927_v26, %v732_v55  ;;  %v734_v62 = vpop.f32.mrf.mxu1 }
 0x1c7   : > { %v735_v31 = vadd.f32 %v734_v62, %v3990_v54 }
 0x1c8   : > { %v1133_v38 = vadd.f32 %v1083_v6, %v977_v63  ;;  %v1366_v4 = vpop.f32.mrf.mxu0  ;;  %v1093_v52 = vpop.f32.mrf.mxu3  ;;  %v1843_v6 = vsel %vm1812_vm5, %v1838_v24, %v1842_v45  ;;  %v3993_v24 = vld [vmem:[#allocation5_spill] sm:$0xff] }
 0x1c9   : > { %2667 = vmatmul.msk.bf16.gmra.mxu1 %vm458_vm2, %v1435_v29 }
 0x1ca   : > { %2686 = vmatmul.msk.bf16.gmra.mxu2 %vm458_vm2, %v1437_v30  ;;  %v3572_v44 = vadd.f32 %v1363_v5, %v1133_v38  ;;  %v1438_v5 = vrot.slane %v2787_v43, 2 }
 0x1cb   : > { %2724 = vmatmul.msk.bf16.gmra.mxu0 %vm458_vm2, %v2103_v20  ;;  %v2104_v20 = vrot.slane %v2787_v43, 3 }
 0x1cc   : > { %3989 = vst [vmem:[#allocation18_spill] sm:$0xff] %v3572_v44  ;;  %2707 = vmatmul.msk.bf16.gmra.mxu3 %vm458_vm2, %v1843_v6 }
 0x1cd   : > { %v930_v15 = vpop.f32.mrf.mxu2 }
 0x1ce   : > { %v978_v55 = vadd.f32 %v930_v15, %v735_v31  ;;  %v736_v26 = vpop.f32.mrf.mxu1  ;;  %v1439_v31 = vsel %vm1424_vm6, %v1436_v23, %v1438_v5  ;;  %v3992_v15 = vld [vmem:[#allocation6_spill] sm:$0xff] }
 0x1cf   : > { %v737_v38 = vadd.f32 %v736_v26, %v3991_v8  ;;  %v1844_v44 = vrot.slane %v3992_v15, 2  ;;  %v2788_v15 = vld [vmem:[%s2857_s25 + $0x48] sm:$0xff] }
 0x1d0   : > { %v1134_v63 = vadd.f32 %v1086_v9, %v978_v55  ;;  %v1368_v35 = vpop.f32.mrf.mxu0  ;;  %v1096_v21 = vpop.f32.mrf.mxu3  ;;  %v1845_v9 = vrot.slane %v3993_v24, 3  ;;  %v3995_v24 = vld [vmem:[#allocation27_spill] sm:$0xff] }
 0x1d2   : > { %v3578_v29 = vadd.f32 %v1366_v4, %v1134_v63  ;;  %v2105_v4 = vsel %vm2092_vm7, %v2102_v22, %v2104_v20  ;;  %v1846_v6 = vor.u32 %v1845_v9, %v1844_v44  ;;  %v3994_v63 = vld [vmem:[#allocation25_spill] sm:$0xff] }
 0x1d5   : > { %v932_v14 = vpop.f32.mrf.mxu2 }
 0x1d6   : > { %v979_v62 = vadd.f32 %v932_v14, %v737_v38  ;;  %v739_v54 = vpop.f32.mrf.mxu1 }
 0x1d7   : > { %v740_v23 = vadd.f32 %v739_v54, %v3994_v63 }
 0x1d8   : > { %v1135_v55 = vadd.f32 %v1088_v18, %v979_v62  ;;  %v1371_v50 = vpop.f32.mrf.mxu0  ;;  %v1098_v8 = vpop.f32.mrf.mxu3  ;;  %v1847_v18 = vsel %vm1812_vm5, %v1842_v45, %v1846_v6 }
 0x1d9   : > { %2668 = vmatmul.msk.bf16.gmra.mxu1 %vm458_vm2, %v1437_v30 }
 0x1da   : > { %2687 = vmatmul.msk.bf16.gmra.mxu2 %vm458_vm2, %v1439_v31  ;;  %v3588_v26 = vadd.f32 %v1368_v35, %v1135_v55  ;;  %v1440_v35 = vrot.slane %v2788_v15, 2 }
 0x1db   : > { %2725 = vmatmul.msk.bf16.gmra.mxu0 %vm458_vm2, %v2105_v4  ;;  %v2106_v4 = vrot.slane %v2788_v15, 3 }
 0x1dc   : > { %2708 = vmatmul.msk.bf16.gmra.mxu3 %vm458_vm2, %v1847_v18 }
 0x1dd   : > { %v935_v43 = vpop.f32.mrf.mxu2 }
 0x1de   : > { %v980_v38 = vadd.f32 %v935_v43, %v740_v23  ;;  %v741_v14 = vpop.f32.mrf.mxu1  ;;  %v1441_v23 = vsel %vm1424_vm6, %v1438_v5, %v1440_v35  ;;  %v1848_v43 = vrot.slane %v2952_v48, 2 }
 0x1df   : > { %v742_v55 = vadd.f32 %v741_v14, %v3995_v24 }
 0x1e0   : > { %v1136_v62 = vadd.f32 %v1091_v60, %v980_v38  ;;  %v1373_v22 = vpop.f32.mrf.mxu0  ;;  %v1101_v9 = vpop.f32.mrf.mxu3  ;;  %v1849_v60 = vrot.slane %v2893_v19, 3 }
 0x1e2   : > { %v3594_v30 = vadd.f32 %v1371_v50, %v1136_v62  ;;  %v2107_v50 = vsel %vm2092_vm7, %v2104_v20, %v2106_v4  ;;  %v1850_v18 = vor.u32 %v1849_v60, %v1848_v43  ;;  %v3996_v62 = vld [vmem:[#allocation29_spill] sm:$0xff] }
 0x1e5   : > { %v937_v44 = vpop.f32.mrf.mxu2 }
 0x1e6   : > { %v981_v54 = vadd.f32 %v937_v44, %v742_v55  ;;  %v744_v63 = vpop.f32.mrf.mxu1  ;;  %v2789_v44 = vld [vmem:[%s2857_s25 + $0x50] sm:$0xff] }
 0x1e7   : > { %v745_v5 = vadd.f32 %v744_v63, %v3996_v62 }
 0x1e8   : > { %v1137_v45 = vadd.f32 %v1093_v52, %v981_v54  ;;  %v1376_v38 = vpop.f32.mrf.mxu0  ;;  %v1103_v48 = vpop.f32.mrf.mxu3  ;;  %v1851_v52 = vsel %vm1812_vm5, %v1846_v6, %v1850_v18  ;;  %v3997_v54 = vld [vmem:[#allocation31_spill] sm:$0xff] }
 0x1e9   : > { %2669 = vmatmul.msk.bf16.gmra.mxu1 %vm458_vm2, %v1439_v31 }
 0x1ea   : > { %2688 = vmatmul.msk.bf16.gmra.mxu2 %vm458_vm2, %v1441_v23  ;;  %v3604_v14 = vadd.f32 %v1373_v22, %v1137_v45  ;;  %v1442_v22 = vrot.slane %v2789_v44, 2 }
 0x1eb   : > { %2726 = vmatmul.msk.bf16.gmra.mxu0 %vm458_vm2, %v2107_v50  ;;  %v2108_v50 = vrot.slane %v2789_v44, 3 }
 0x1ec   : > { %2709 = vmatmul.msk.bf16.gmra.mxu3 %vm458_vm2, %v1851_v52 }
 0x1ed   : > { %v940_v15 = vpop.f32.mrf.mxu2 }
 0x1ee   : > { %v982_v24 = vadd.f32 %v940_v15, %v745_v5  ;;  %v746_v19 = vpop.f32.mrf.mxu1  ;;  %v1443_v5 = vsel %vm1424_vm6, %v1440_v35, %v1442_v22  ;;  %v1852_v15 = vrot.slane %v3021_v33, 2 }
 0x1ef   : > { %v747_v45 = vadd.f32 %v746_v19, %v3997_v54 }
 0x1f0   : > { %v1138_v55 = vadd.f32 %v1096_v21, %v982_v24  ;;  %v1378_v20 = vpop.f32.mrf.mxu0  ;;  %v1964_v60 = vpop.f32.mrf.mxu3  ;;  %v1853_v21 = vrot.slane %v2955_v49, 3 }
 0x1f2   : > { %v3610_v31 = vadd.f32 %v1376_v38, %v1138_v55  ;;  %v2109_v38 = vsel %vm2092_vm7, %v2106_v4, %v2108_v50  ;;  %v1854_v52 = vor.u32 %v1853_v21, %v1852_v15  ;;  %v3998_v55 = vld [vmem:[#allocation33_spill] sm:$0xff] }
 0x1f5   : > { %v942_v43 = vpop.f32.mrf.mxu2 }
 0x1f6   : > { %v983_v63 = vadd.f32 %v942_v43, %v747_v45  ;;  %v749_v62 = vpop.f32.mrf.mxu1  ;;  %v2790_v43 = vld [vmem:[%s2857_s25 + $0x58] sm:$0xff] }
 0x1f7   : > { %v750_v35 = vadd.f32 %v749_v62, %v3998_v55 }
 0x1f8   : > { %v1139_v6 = vadd.f32 %v1098_v8, %v983_v63  ;;  %v1381_v24 = vpop.f32.mrf.mxu0  ;;  %v1966_v33 = vpop.f32.mrf.mxu3  ;;  %v1855_v8 = vsel %vm1812_vm5, %v1850_v18, %v1854_v52  ;;  %v3999_v63 = vld [vmem:[#allocation36_spill] sm:$0xff] }
 0x1f9   : > { %2670 = vmatmul.msk.bf16.gmra.mxu1 %vm458_vm2, %v1441_v23 }
 0x1fa   : > { %2689 = vmatmul.msk.bf16.gmra.mxu2 %vm458_vm2, %v1443_v5  ;;  %v3620_v19 = vadd.f32 %v1378_v20, %v1139_v6  ;;  %v1444_v20 = vrot.slane %v2790_v43, 2 }
 0x1fb   : > { %2727 = vmatmul.msk.bf16.gmra.mxu0 %vm458_vm2, %v2109_v38  ;;  %v2110_v38 = vrot.slane %v2790_v43, 3 }
 0x1fc   : > { %2710 = vmatmul.msk.bf16.gmra.mxu3 %vm458_vm2, %v1855_v8 }
 0x1fd   : > { %v945_v44 = vpop.f32.mrf.mxu2 }
 0x1fe   : > { %v984_v54 = vadd.f32 %v945_v44, %v750_v35  ;;  %v751_v49 = vpop.f32.mrf.mxu1  ;;  %v1445_v35 = vsel %vm1424_vm6, %v1442_v22, %v1444_v20  ;;  %v1856_v44 = vrot.slane %v3080_v0, 2 }
 0x1ff   : > { %v752_v6 = vadd.f32 %v751_v49, %v3999_v63 }
 0x200   : > { %v1140_v45 = vadd.f32 %v1101_v9, %v984_v54  ;;  %v1383_v4 = vpop.f32.mrf.mxu0  ;;  %v1969_v21 = vpop.f32.mrf.mxu3  ;;  %v1857_v9 = vrot.slane %v3024_v34, 3 }
 0x202   : > { %v3626_v23 = vadd.f32 %v1381_v24, %v1140_v45  ;;  %v2111_v24 = vsel %vm2092_vm7, %v2108_v50, %v2110_v38  ;;  %v1858_v8 = vor.u32 %v1857_v9, %v1856_v44  ;;  %v3644_v50 = vld [vmem:[%s3873_s2] ss:$0 sm:$0xff] }
 0x204   : > { %v1859_v43 = vsel %vm1812_vm5, %v1854_v52, %v1858_v8 }
 0x205   : > { %v947_v15 = vpop.f32.mrf.mxu2 }
 0x206   : > { %v985_v62 = vadd.f32 %v947_v15, %v752_v6  ;;  %v1528_v55 = vpop.f32.mrf.mxu1  ;;  %v2791_v6 = vld [vmem:[%s2857_s25 + $0x60] sm:$0xff] }
 0x207   : > { %v1618_v22 = vadd.f32 %v1528_v55, %v3311_v47  ;;  %v1446_v15 = vrot.slane %v2791_v6, 2  ;;  %v2112_v55 = vrot.slane %v2791_v6, 3 }
 0x208   : > { %v1141_v18 = vadd.f32 %v1103_v48, %v985_v62  ;;  %v2196_v54 = vpop.f32.mrf.mxu0  ;;  %v1971_v45 = vpop.f32.mrf.mxu3 }
 0x209   : > { %2671 = vmatmul.msk.bf16.gmra.mxu1 %vm458_vm2, %v1443_v5 }
 0x20a   : > { %2690 = vmatmul.msk.bf16.gmra.mxu2 %vm458_vm2, %v1445_v35  ;;  %v3636_v49 = vadd.f32 %v1383_v4, %v1141_v18 }
 0x20b   : > { %2728 = vmatmul.msk.bf16.gmra.mxu0 %vm458_vm2, %v2111_v24  ;;  %v1860_v24 = vrot.slane %v3119_v7, 2 }
 0x20c   : > { %2711 = vmatmul.msk.bf16.gmra.mxu3 %vm458_vm2, %v1859_v43 }
 0x20d   : > { %v1684_v0 = vpop.f32.mrf.mxu2 }
 0x20e   : > { %v1774_v34 = vadd.f32 %v1684_v0, %v1618_v22  ;;  %v1530_v48 = vpop.f32.mrf.mxu1  ;;  %v1861_v22 = vrot.slane %v3083_v56, 3 }
 0x20f   : > { %v1619_v62 = vadd.f32 %v1530_v48, %v3318_v37 }
 0x210   : > { %v2054_v63 = vadd.f32 %v1964_v60, %v1774_v34  ;;  %v2198_v5 = vpop.f32.mrf.mxu0  ;;  %v1974_v52 = vpop.f32.mrf.mxu3  ;;  %v2113_v34 = vsel %vm2092_vm7, %v2110_v38, %v2112_v55  ;;  %v1862_v43 = vor.u32 %v1861_v22, %v1860_v24 }
 0x212   : > { %v2286_v4 = vadd.f32 %v2196_v54, %v2054_v63  ;;  %v1447_v54 = vsel %vm1424_vm6, %v1444_v20, %v1446_v15  ;;  %v1863_v38 = vsel %vm1812_vm5, %v1858_v8, %v1862_v43 }
 0x214   : > { %v2326_v47 = vadd.f32 %v3644_v50, %v2286_v4 }
 0x215   : > { %v1686_v60 = vpop.f32.mrf.mxu2 }
 0x216   : > { %v2362_v44 = vmax.f32 %v2326_v47, 0.0  ;;  %v1775_v9 = vadd.f32 %v1686_v60, %v1619_v62  ;;  %v1533_v18 = vpop.f32.mrf.mxu1  ;;  %v2792_v62 = vld [vmem:[%s2857_s25 + $0x68] sm:$0xff] }
 0x217   : > { %v1620_v7 = vadd.f32 %v1533_v18, %v3330_v28  ;;  %v1448_v60 = vrot.slane %v2792_v62, 2 }
 0x218   : > { %2398 = vst [vmem:[%s3654_s16] sm:$0xff] %v2362_v44  ;;  %v2055_v37 = vadd.f32 %v1966_v33, %v1775_v9  ;;  %v2201_v0 = vpop.f32.mrf.mxu0  ;;  %v1976_v63 = vpop.f32.mrf.mxu3  ;;  %v2114_v9 = vrot.slane %v2792_v62, 3 }
 0x219   : > { %2672 = vmatmul.msk.bf16.gmra.mxu1 %vm458_vm2, %v1445_v35  ;;  %v1449_v8 = vsel %vm1424_vm6, %v1446_v15, %v1448_v60 }
 0x21a   : > { %v2287_v48 = vadd.f32 %v2198_v5, %v2055_v37  ;;  %2691 = vmatmul.msk.bf16.gmra.mxu2 %vm458_vm2, %v1447_v54 }
 0x21b   : > { %2729 = vmatmul.msk.bf16.gmra.mxu0 %vm458_vm2, %v2113_v34 }
 0x21c   : > { %v2327_v20 = vadd.f32 %v3644_v50, %v2287_v48  ;;  %2712 = vmatmul.msk.bf16.gmra.mxu3 %vm458_vm2, %v1863_v38 }
 0x21d   : > { %v1689_v56 = vpop.f32.mrf.mxu2 }
 0x21e   : > { %v2363_v33 = vmax.f32 %v2327_v20, 0.0  ;;  %v1776_v4 = vadd.f32 %v1689_v56, %v1620_v7  ;;  %v1535_v6 = vpop.f32.mrf.mxu1  ;;  %v2115_v7 = vsel %vm2092_vm7, %v2112_v55, %v2114_v9 }
 0x21f   : > { %v1621_v28 = vadd.f32 %v1535_v6, %v3338_v12 }
 0x220   : > { %2399 = vst [vmem:[%s3654_s16 + $0x8] sm:$0xff] %v2363_v33  ;;  %v2056_v5 = vadd.f32 %v1969_v21, %v1776_v4  ;;  %v2203_v35 = vpop.f32.mrf.mxu0  ;;  %v1979_v24 = vpop.f32.mrf.mxu3  ;;  %v1864_v21 = vrot.slane %v2932_v40, 2 }
 0x222   : > { %v2288_v47 = vadd.f32 %v2201_v0, %v2056_v5  ;;  %v1865_v0 = vrot.slane %v2929_v39, 3 }
 0x224   : > { %v2328_v44 = vadd.f32 %v3644_v50, %v2288_v47  ;;  %v1866_v12 = vor.u32 %v1865_v0, %v1864_v21  ;;  %v1869_v21 = vrot.slane %v2935_v41, 3 }
 0x225   : > { %v1691_v18 = vpop.f32.mrf.mxu2 }
 0x226   : > { %v2364_v22 = vmax.f32 %v2328_v44, 0.0  ;;  %v1777_v37 = vadd.f32 %v1691_v18, %v1621_v28  ;;  %v1538_v34 = vpop.f32.mrf.mxu1  ;;  %v1867_v55 = vsel %vm1812_vm5, %v1862_v43, %v1866_v12 }
 0x227   : > { %v1622_v40 = vadd.f32 %v1538_v34, %v3350_v3 }
 0x228   : > { %2400 = vst [vmem:[%s3654_s16 + $0x10] sm:$0xff] %v2364_v22  ;;  %v2057_v48 = vadd.f32 %v1971_v45, %v1777_v37  ;;  %v2206_v20 = vpop.f32.mrf.mxu0  ;;  %v1981_v33 = vpop.f32.mrf.mxu3 }
 0x229   : > { %2673 = vmatmul.msk.bf16.gmra.mxu1 %vm458_vm2, %v1447_v54 }
 0x22a   : > { %v2289_v56 = vadd.f32 %v2203_v35, %v2057_v48  ;;  %2692 = vmatmul.msk.bf16.gmra.mxu2 %vm458_vm2, %v1449_v8  ;;  %v2793_v35 = vld [vmem:[%s2857_s25 + $0x70] sm:$0xff] }
 0x22b   : > { %2730 = vmatmul.msk.bf16.gmra.mxu0 %vm458_vm2, %v2115_v7  ;;  %v1450_v47 = vrot.slane %v2793_v35, 2  ;;  %v2116_v44 = vrot.slane %v2793_v35, 3 }
 0x22c   : > { %v2329_v15 = vadd.f32 %v3644_v50, %v2289_v56  ;;  %2713 = vmatmul.msk.bf16.gmra.mxu3 %vm458_vm2, %v1867_v55 }
 0x22d   : > { %v1694_v39 = vpop.f32.mrf.mxu2  ;;  %v1451_v43 = vsel %vm1424_vm6, %v1448_v60, %v1450_v47 }
 0x22e   : > { %v2365_v45 = vmax.f32 %v2329_v15, 0.0  ;;  %v1778_v4 = vadd.f32 %v1694_v39, %v1622_v40  ;;  %v1540_v6 = vpop.f32.mrf.mxu1 }
 0x22f   : > { %v1623_v3 = vadd.f32 %v1540_v6, %v3358_v53 }
 0x230   : > { %2401 = vst [vmem:[%s3654_s16 + $0x18] sm:$0xff] %v2365_v45  ;;  %v2058_v38 = vadd.f32 %v1974_v52, %v1778_v4  ;;  %v2208_v54 = vpop.f32.mrf.mxu0  ;;  %v1984_v18 = vpop.f32.mrf.mxu3  ;;  %v1868_v52 = vrot.slane %v2983_v1, 2  ;;  %v2794_v4 = vld [vmem:[%s2857_s25 + $0x78] sm:$0xff] }
 0x231   : > { %v1452_v6 = vrot.slane %v2794_v4, 2 }
 0x232   : > { %v2290_v5 = vadd.f32 %v2206_v20, %v2058_v38  ;;  %v2117_v20 = vsel %vm2092_vm7, %v2114_v9, %v2116_v44  ;;  %v1870_v53 = vor.u32 %v1869_v21, %v1868_v52  ;;  %v2118_v38 = vrot.slane %v2794_v4, 3 }
 0x233   : > { %v4001_v4 = vshll.u32 %v3950_v51, 16 }
 0x234   : > { %v2330_v62 = vadd.f32 %v3644_v50, %v2290_v5  ;;  %v1871_v9 = vsel %vm1812_vm5, %v1866_v12, %v1870_v53  ;;  %v1453_v12 = vsel %vm1424_vm6, %v1450_v47, %v1452_v6 }
 0x235   : > { %v1696_v28 = vpop.f32.mrf.mxu2 }
 0x236   : > { %v2366_v22 = vmax.f32 %v2330_v62, 0.0  ;;  %v1779_v37 = vadd.f32 %v1696_v28, %v1623_v3  ;;  %v1543_v34 = vpop.f32.mrf.mxu1  ;;  %v1873_v28 = vrot.slane %v3952_v2, 3 }
 0x237   : > { %v1624_v1 = vadd.f32 %v1543_v34, %v3370_v10  ;;  %v2119_v34 = vsel %vm2092_vm7, %v2116_v44, %v2118_v38 }
 0x238   : > { %2402 = vst [vmem:[%s3654_s16 + $0x20] sm:$0xff] %v2366_v22  ;;  %v2059_v0 = vadd.f32 %v1976_v63, %v1779_v37  ;;  %v2211_v48 = vpop.f32.mrf.mxu0  ;;  %v1986_v56 = vpop.f32.mrf.mxu3 }
 0x239   : > { %2674 = vmatmul.msk.bf16.gmra.mxu1 %vm458_vm2, %v1449_v8 }
 0x23a   : > { %v2291_v7 = vadd.f32 %v2208_v54, %v2059_v0  ;;  %2693 = vmatmul.msk.bf16.gmra.mxu2 %vm458_vm2, %v1451_v43 }
 0x23b   : > { %2731 = vmatmul.msk.bf16.gmra.mxu0 %vm458_vm2, %v2117_v20 }
 0x23c   : > { %v2331_v60 = vadd.f32 %v3644_v50, %v2291_v7  ;;  %2714 = vmatmul.msk.bf16.gmra.mxu3 %vm458_vm2, %v1871_v9 }
 0x23d   : > { %v1699_v41 = vpop.f32.mrf.mxu2 }
 0x23e   : > { %v2367_v63 = vmax.f32 %v2331_v60, 0.0  ;;  %v1780_v15 = vadd.f32 %v1699_v41, %v1624_v1  ;;  %v1545_v40 = vpop.f32.mrf.mxu1  ;;  %v2795_v60 = vld [vmem:[%s2857_s25 + $0x80] sm:$0xff] }
 0x23f   : > { %v1625_v10 = vadd.f32 %v1545_v40, %v3378_v17  ;;  %v1454_v1 = vrot.slane %v2795_v60, 2 }
 0x240   : > { %2403 = vst [vmem:[%s3654_s16 + $0x28] sm:$0xff] %v2367_v63  ;;  %v2060_v39 = vadd.f32 %v1979_v24, %v1780_v15  ;;  %v2213_v8 = vpop.f32.mrf.mxu0  ;;  %v1989_v5 = vpop.f32.mrf.mxu3  ;;  %v1872_v24 = vrot.slane %v3951_v25, 2  ;;  %v2120_v63 = vrot.slane %v2795_v60, 3 }
 0x242   : > { %v2292_v45 = vadd.f32 %v2211_v48, %v2060_v39  ;;  %v1874_v17 = vor.u32 %v1873_v28, %v1872_v24 }
 0x244   : > { %v2332_v55 = vadd.f32 %v3644_v50, %v2292_v45  ;;  %v1875_v44 = vsel %vm1812_vm5, %v1870_v53, %v1874_v17 }
 0x245   : > { %v1701_v54 = vpop.f32.mrf.mxu2 }
 0x246   : > { %v2368_v35 = vmax.f32 %v2332_v55, 0.0  ;;  %v1781_v62 = vadd.f32 %v1701_v54, %v1625_v10  ;;  %v1548_v3 = vpop.f32.mrf.mxu1  ;;  %v1877_v55 = vrot.slane %v4001_v4, 3 }
 0x247   : > { %v1626_v25 = vadd.f32 %v1548_v3, %v3390_v11 }
 0x248   : > { %2404 = vst [vmem:[%s3654_s16 + $0x30] sm:$0xff] %v2368_v35  ;;  %v2061_v22 = vadd.f32 %v1981_v33, %v1781_v62  ;;  %v2216_v37 = vpop.f32.mrf.mxu0  ;;  %v1991_v21 = vpop.f32.mrf.mxu3 }
 0x249   : > { %2675 = vmatmul.msk.bf16.gmra.mxu1 %vm458_vm2, %v1451_v43 }
 0x24a   : > { %v2293_v52 = vadd.f32 %v2213_v8, %v2061_v22  ;;  %2694 = vmatmul.msk.bf16.gmra.mxu2 %vm458_vm2, %v1453_v12  ;;  %v4000_v8 = vshrl.u32 %v3950_v51, 16 }
 0x24b   : > { %2732 = vmatmul.msk.bf16.gmra.mxu0 %vm458_vm2, %v2119_v34 }
 0x24c   : > { %v2333_v47 = vadd.f32 %v3644_v50, %v2293_v52  ;;  %2715 = vmatmul.msk.bf16.gmra.mxu3 %vm458_vm2, %v1875_v44  ;;  %v1876_v45 = vrot.slane %v4000_v8, 2  ;;  %v2796_v52 = vld [vmem:[%s2857_s25 + $0x88] sm:$0xff] }
 0x24d   : > { %v1704_v2 = vpop.f32.mrf.mxu2 }
 0x24e   : > { %v2369_v33 = vmax.f32 %v2333_v47, 0.0  ;;  %v1782_v0 = vadd.f32 %v1704_v2, %v1626_v25  ;;  %v1550_v48 = vpop.f32.mrf.mxu1  ;;  %v1456_v47 = vrot.slane %v2796_v52, 2  ;;  %v3741_v25 = vld [vmem:[%s2857_s25 + $0x98] sm:$0xff]  }
 0x24f   : > { %v1627_v11 = vadd.f32 %v1550_v48, %v3398_v46  ;;  %v2121_v46 = vsel %vm2092_vm7, %v2118_v38, %v2120_v63  ;;  %v1884_v2 = vshll.u32 %v3741_v25, 16 }
 0x250   : > { %2405 = vst [vmem:[%s3654_s16 + $0x38] sm:$0xff] %v2369_v33  ;;  %v2062_v20 = vadd.f32 %v1984_v18, %v1782_v0  ;;  %v2218_v43 = vpop.f32.mrf.mxu0  ;;  %v3720_v40 = vpop.f32.mrf.mxu3  ;;  %v1455_v18 = vsel %vm1424_vm6, %v1452_v6, %v1454_v1  ;;  %v1878_v6 = vor.u32 %v1877_v55, %v1876_v45  ;;  %v2122_v0 = vrot.slane %v2796_v52, 3 }
 0x252   : > { %v2294_v7 = vadd.f32 %v2216_v37, %v2062_v20  ;;  %v1879_v22 = vsel %vm1812_vm5, %v1874_v17, %v1878_v6 }
 0x254   : > { %v2334_v41 = vadd.f32 %v3644_v50, %v2294_v7  ;;  %v1457_v7 = vsel %vm1424_vm6, %v1454_v1, %v1456_v47 }
 0x255   : > { %v1706_v15 = vpop.f32.mrf.mxu2 }
 0x256   : > { %v2370_v9 = vmax.f32 %v2334_v41, 0.0  ;;  %v1783_v39 = vadd.f32 %v1706_v15, %v1627_v11  ;;  %v1553_v53 = vpop.f32.mrf.mxu1  ;;  %v1886_v41 = vrot.slane %v1884_v2, 3 }
 0x257   : > { %v1628_v51 = vadd.f32 %v1553_v53, %v3413_v16  ;;  %v1881_v16 = vshrl.u32 %v3741_v25, 16 }
 0x258   : > { %2406 = vst [vmem:[%s3654_s16 + $0x40] sm:$0xff] %v2370_v9  ;;  %v2063_v10 = vadd.f32 %v1986_v56, %v1783_v39  ;;  %v2221_v54 = vpop.f32.mrf.mxu0  ;;  %v3734_v56 = vpop.f32.mrf.mxu3  ;;  %v2123_v9 = vsel %vm2092_vm7, %v2120_v63, %v2122_v0  ;;  %v212_v39 = vld [vmem:[%s2857_s25 + $0xa0] sm:$0x7] }
 0x259   : > { %2676 = vmatmul.msk.bf16.gmra.mxu1 %vm458_vm2, %v1453_v12  ;;  %v1883_v60 = vrot.slane %v1881_v16, 2  ;;  %v1659_v8 = vunpack.c.l.b16 %v212_v39  ;;  %v1662_v39 = vrot.slane %v3741_v25, 2 }
 0x25a   : > { %v2295_v35 = vadd.f32 %v2218_v43, %v2063_v10  ;;  %2695 = vmatmul.msk.bf16.gmra.mxu2 %vm458_vm2, %v1455_v18 }
 0x25b   : > { %2733 = vmatmul.msk.bf16.gmra.mxu0 %vm458_vm2, %v2121_v46  ;;  %v3759_v46 = vpack.c.b16 %v1659_v8, %v1659_v8  ;;  %v2126_v8 = vrot.slane %v3741_v25, 3 }
 0x25c   : > { %v2335_v62 = vadd.f32 %v3644_v50, %v2295_v35  ;;  %2716 = vmatmul.msk.bf16.gmra.mxu3 %vm458_vm2, %v1879_v22 }
 0x25d   : > { %v1709_v3 = vpop.f32.mrf.mxu2 }
 0x25e   : > { %v2371_v24 = vmax.f32 %v2335_v62, 0.0  ;;  %v1784_v28 = vadd.f32 %v1709_v3, %v1628_v51  ;;  %v1555_v38 = vpop.f32.mrf.mxu1  ;;  %v2798_v51 = vld [vmem:[%s2857_s25 + $0x90] sm:$0xff]  }
 0x25f   : > { %v1629_v17 = vadd.f32 %v1555_v38, %v3421_v58  ;;  %v1887_v58 = vor.u32 %v1886_v41, %v1883_v60  ;;  %v3765_v3 = vrot.slane %v2798_v51, 2  ;;  %v2124_v38 = vrot.slane %v2798_v51, 3 }
 0x260   : > { %2407 = vst [vmem:[%s3654_s16 + $0x48] sm:$0xff] %v2371_v24  ;;  %v2064_v12 = vadd.f32 %v1989_v5, %v1784_v28  ;;  %v2223_v37 = vpop.f32.mrf.mxu0  ;;  %v3747_v48 = vpop.f32.mrf.mxu3  ;;  %v1893_v24 = vshll.u32 %v3759_v46, 16 }
 0x261   : > { %v1459_v52 = vsel %vm1424_vm6, %v1456_v47, %v3765_v3 }
 0x262   : > { %v2296_v34 = vadd.f32 %v2221_v54, %v2064_v12  ;;  %v1888_v54 = vsel %vm1812_vm5, %v1878_v6, %v1887_v58  ;;  %v1895_v2 = vrot.slane %v1893_v24, 3 }
 0x264   : > { %v2336_v33 = vadd.f32 %v3644_v50, %v2296_v34 }
 0x265   : > { %v1711_v5 = vpop.f32.mrf.mxu2 }
 0x266   : > { %v2372_v44 = vmax.f32 %v2336_v33, 0.0  ;;  %v1785_v20 = vadd.f32 %v1711_v5, %v1629_v17  ;;  %v1558_v43 = vpop.f32.mrf.mxu1  ;;  %v2125_v5 = vsel %vm2092_vm7, %v2122_v0, %v2124_v38 }
 0x267   : > { %v1630_v45 = vadd.f32 %v1558_v43, %v3432_v42  ;;  %v1890_v42 = vshrl.u32 %v3759_v46, 16 }
 0x268   : > { %2408 = vst [vmem:[%s3654_s16 + $0x50] sm:$0xff] %v2372_v44  ;;  %v2065_v11 = vadd.f32 %v1991_v21, %v1785_v20  ;;  %v2226_v15 = vpop.f32.mrf.mxu0  ;;  %v2001_v4 = vpop.f32.mrf.mxu3 }
 0x269   : > { %2677 = vmatmul.msk.bf16.gmra.mxu1 %vm458_vm2, %v1455_v18  ;;  %v1892_v16 = vrot.slane %v1890_v42, 2 }
 0x26a   : > { %v2297_v53 = vadd.f32 %v2223_v37, %v2065_v11  ;;  %2696 = vmatmul.msk.bf16.gmra.mxu2 %vm458_vm2, %v1457_v7 }
 0x26b   : > { %2734 = vmatmul.msk.bf16.gmra.mxu0 %vm458_vm2, %v2123_v9 }
 0x26c   : > { %v2337_v1 = vadd.f32 %v3644_v50, %v2297_v53  ;;  %2717 = vmatmul.msk.bf16.gmra.mxu3 %vm458_vm2, %v1888_v54  ;;  %v2127_v54 = vsel %vm2092_vm7, %v2124_v38, %v2126_v8  ;;  %v1460_v38 = vrot.slane %v3435_v13, 2 }
 0x26d   : > { %v1714_v21 = vpop.f32.mrf.mxu2 }
 0x26e   : > { %v2373_v55 = vmax.f32 %v2337_v1, 0.0  ;;  %v1786_v63 = vadd.f32 %v1714_v21, %v1630_v45  ;;  %v1560_v10 = vpop.f32.mrf.mxu1 }
 0x26f   : > { %v1631_v6 = vadd.f32 %v1560_v10, %v3442_v57  ;;  %v1896_v57 = vor.u32 %v1895_v2, %v1892_v16 }
 0x270   : > { %2409 = vst [vmem:[%s3654_s16 + $0x58] sm:$0xff] %v2373_v55  ;;  %v2066_v18 = vadd.f32 %v3720_v40, %v1786_v63  ;;  %v2228_v35 = vpop.f32.mrf.mxu0  ;;  %v2004_v12 = vpop.f32.mrf.mxu3 }
 0x272   : > { %v2298_v62 = vadd.f32 %v2226_v15, %v2066_v18  ;;  %v1897_v15 = vsel %vm1812_vm5, %v1887_v58, %v1896_v57 }
 0x274   : > { %v2338_v28 = vadd.f32 %v3644_v50, %v2298_v62 }
 0x275   : > { %v1716_v22 = vpop.f32.mrf.mxu2 }
 0x276   : > { %v2374_v40 = vmax.f32 %v2338_v28, 0.0  ;;  %v1787_v37 = vadd.f32 %v1716_v22, %v1631_v6  ;;  %v1563_v34 = vpop.f32.mrf.mxu1  ;;  %v1664_v22 = vrot.slane %v3759_v46, 2 }
 0x277   : > { %v1632_v47 = vadd.f32 %v1563_v34, %v3455_v27 }
 0x278   : > { %2410 = vst [vmem:[%s3654_s16 + $0x60] sm:$0xff] %v2374_v40  ;;  %v2067_v33 = vadd.f32 %v3734_v56, %v1787_v37  ;;  %v2231_v17 = vpop.f32.mrf.mxu0  ;;  %v2006_v60 = vpop.f32.mrf.mxu3 }
 0x279   : > { %2678 = vmatmul.msk.bf16.gmra.mxu1 %vm458_vm2, %v1457_v7 }
 0x27a   : > { %v2299_v44 = vadd.f32 %v2228_v35, %v2067_v33  ;;  %2697 = vmatmul.msk.bf16.gmra.mxu2 %vm458_vm2, %v1459_v52 }
 0x27b   : > { %2735 = vmatmul.msk.bf16.gmra.mxu0 %vm458_vm2, %v2125_v5 }
 0x27c   : > { %v2339_v20 = vadd.f32 %v3644_v50, %v2299_v44  ;;  %2718 = vmatmul.msk.bf16.gmra.mxu3 %vm458_vm2, %v1897_v15 }
 0x27d   : > { %v1719_v43 = vpop.f32.mrf.mxu2 }
 0x27e   : > { %v2375_v41 = vmax.f32 %v2339_v20, 0.0  ;;  %v1788_v56 = vadd.f32 %v1719_v43, %v1632_v47  ;;  %v1565_v11 = vpop.f32.mrf.mxu1 }
 0x27f   : > { %v1633_v27 = vadd.f32 %v1565_v11, %v3467_v36 }
 0x280   : > { %2411 = vst [vmem:[%s3654_s16 + $0x68] sm:$0xff] %v2375_v41  ;;  %v2068_v0 = vadd.f32 %v3747_v48, %v1788_v56  ;;  %v2233_v7 = vpop.f32.mrf.mxu0  ;;  %v2009_v45 = vpop.f32.mrf.mxu3  ;;  %v1663_v48 = vsel %vm1424_vm6, %v3765_v3, %v1662_v39 }
 0x282   : > { %v2300_v9 = vadd.f32 %v2231_v17, %v2068_v0  ;;  %v1665_v17 = vsel %vm1424_vm6, %v1662_v39, %v1664_v22  ;;  %v4002_v0 = vld [vmem:[#allocation13_spill] sm:$0xff] }
 0x284   : > { %v2340_v53 = vadd.f32 %v3644_v50, %v2300_v9 }
 0x285   : > { %v1721_v1 = vpop.f32.mrf.mxu2 }
 0x286   : > { %v2376_v21 = vmax.f32 %v2340_v53, 0.0  ;;  %v1789_v58 = vadd.f32 %v1721_v1, %v1633_v27  ;;  %v1568_v55 = vpop.f32.mrf.mxu1 }
 0x287   : > { %v1634_v25 = vadd.f32 %v1568_v55, %v3475_v61  ;;  %v2128_v61 = vrot.slane %v3759_v46, 3  ;;  %v4003_v55 = vld [vmem:[#allocation20_spill] sm:$0xff] }
 0x288   : > { %2412 = vst [vmem:[%s3654_s16 + $0x70] sm:$0xff] %v2376_v21  ;;  %v2069_v63 = vadd.f32 %v2001_v4, %v1789_v58  ;;  %v2236_v10 = vpop.f32.mrf.mxu0  ;;  %v2011_v62 = vpop.f32.mrf.mxu3 }
 0x289   : > { %2679 = vmatmul.msk.bf16.gmra.mxu1 %vm458_vm2, %v1459_v52  ;;  %v2129_v44 = vsel %vm2092_vm7, %v2126_v8, %v2128_v61 }
 0x28a   : > { %v2301_v18 = vadd.f32 %v2233_v7, %v2069_v63  ;;  %2698 = vmatmul.msk.bf16.gmra.mxu2 %vm458_vm2, %v1663_v48 }
 0x28b   : > { %2736 = vmatmul.msk.bf16.gmra.mxu0 %vm458_vm2, %v2127_v54 }
 0x28c   : > { %v2341_v36 = vadd.f32 %v3644_v50, %v2301_v18 }
 0x28d   : > { %v1724_v35 = vpop.f32.mrf.mxu2 }
 0x28e   : > { %v2377_v51 = vmax.f32 %v2341_v36, 0.0  ;;  %v1790_v42 = vadd.f32 %v1724_v35, %v1634_v25  ;;  %v1570_v24 = vpop.f32.mrf.mxu1 }
 0x28f   : > { %v1635_v37 = vadd.f32 %v1570_v24, %v3487_v32 }
 0x290   : > { %2413 = vst [vmem:[%s3654_s16 + $0x78] sm:$0xff] %v2377_v51  ;;  %v2070_v4 = vadd.f32 %v2004_v12, %v1790_v42  ;;  %v2238_v28 = vpop.f32.mrf.mxu0  ;;  %v2014_v52 = vpop.f32.mrf.mxu3  ;;  %v1461_v12 = vsel %vm1424_vm6, %v3765_v3, %v1460_v38  ;;  %v4004_v42 = vld [vmem:[#allocation9_spill] sm:$0xff] }
 0x292   : > { %v2302_v6 = vadd.f32 %v2236_v10, %v2070_v4 }
 0x294   : > { %v2342_v40 = vadd.f32 %v3644_v50, %v2302_v6 }
 0x295   : > { %v1726_v34 = vpop.f32.mrf.mxu2 }
 0x296   : > { %v2378_v16 = vmax.f32 %v2342_v40, 0.0  ;;  %v1791_v2 = vadd.f32 %v1726_v34, %v1635_v37  ;;  %v1573_v33 = vpop.f32.mrf.mxu1  ;;  %v4005_v34 = vld [vmem:[#allocation17_spill] sm:$0xff] }
 0x297   : > { %v1636_v46 = vadd.f32 %v1573_v33, %v3493_v59 }
 0x298   : > { %2414 = vst [vmem:[%s3654_s16 + $0x80] sm:$0xff] %v2378_v16  ;;  %v2071_v13 = vadd.f32 %v2006_v60, %v1791_v2  ;;  %v2241_v5 = vpop.f32.mrf.mxu0  ;;  %v2016_v20 = vpop.f32.mrf.mxu3 }
 0x299   : > { %2680 = vmatmul.msk.bf16.gmra.mxu1 %vm458_vm2, %v1461_v12 }
 0x29a   : > { %v2303_v57 = vadd.f32 %v2238_v28, %v2071_v13  ;;  %2699 = vmatmul.msk.bf16.gmra.mxu2 %vm458_vm2, %v1665_v17 }
 0x29b   : > { %2737 = vmatmul.msk.bf16.gmra.mxu0 %vm458_vm2, %v2129_v44 }
 0x29c   : > { %v2343_v32 = vadd.f32 %v3644_v50, %v2303_v57 }
 0x29d   : > { %v1729_v3 = vpop.f32.mrf.mxu2 }
 0x29e   : > { %v2379_v47 = vmax.f32 %v2343_v32, 0.0  ;;  %v1792_v43 = vadd.f32 %v1729_v3, %v1636_v46  ;;  %v1575_v60 = vpop.f32.mrf.mxu1  ;;  %v4006_v32 = vld [vmem:[#allocation34_spill] sm:$0xff] }
 0x29f   : > { %v1637_v7 = vadd.f32 %v1575_v60, %v4002_v0 }
 0x2a0   : > { %2415 = vst [vmem:[%s3654_s16 + $0x88] sm:$0xff] %v2379_v47  ;;  %v2072_v41 = vadd.f32 %v2009_v45, %v1792_v43  ;;  %v2243_v56 = vpop.f32.mrf.mxu0  ;;  %v2019_v39 = vpop.f32.mrf.mxu3 }
 0x2a2   : > { %v2304_v11 = vadd.f32 %v2241_v5, %v2072_v41 }
 0x2a4   : > { %v2344_v15 = vadd.f32 %v3644_v50, %v2304_v11 }
 0x2a5   : > { %v1731_v9 = vpop.f32.mrf.mxu2 }
 0x2a6   : > { %v2380_v53 = vmax.f32 %v2344_v15, 0.0  ;;  %v1793_v27 = vadd.f32 %v1731_v9, %v1637_v7  ;;  %v1578_v59 = vpop.f32.mrf.mxu1  ;;  %v4007_v15 = vld [vmem:[#allocation19_spill] sm:$0xff] }
 0x2a7   : > { %v1638_v45 = vadd.f32 %v1578_v59, %v4003_v55 }
 0x2a8   : > { %2416 = vst [vmem:[%s3654_s16 + $0x90] sm:$0xff] %v2380_v53  ;;  %v2073_v8 = vadd.f32 %v2011_v62, %v1793_v27  ;;  %v2246_v1 = vpop.f32.mrf.mxu0  ;;  %v2021_v18 = vpop.f32.mrf.mxu3 }
 0x2aa   : > { %v2305_v21 = vadd.f32 %v2243_v56, %v2073_v8 }
 0x2ac   : > { %v2345_v58 = vadd.f32 %v3644_v50, %v2305_v21 }
 0x2ad   : > { %v1734_v48 = vpop.f32.mrf.mxu2 }
 0x2ae   : > { %v2381_v63 = vmax.f32 %v2345_v58, 0.0  ;;  %v1794_v10 = vadd.f32 %v1734_v48, %v1638_v45  ;;  %v1580_v54 = vpop.f32.mrf.mxu1  ;;  %v4008_v58 = vld [vmem:[#allocation37_spill] sm:$0xff] }
 0x2af   : > { %v1639_v62 = vadd.f32 %v1580_v54, %v4004_v42 }
 0x2b0   : > { %2417 = vst [vmem:[%s3654_s16 + $0x98] sm:$0xff] %v2381_v63  ;;  %v2074_v36 = vadd.f32 %v2014_v52, %v1794_v10  ;;  %v2248_v25 = vpop.f32.mrf.mxu0  ;;  %v2024_v40 = vpop.f32.mrf.mxu3 }
 0x2b2   : > { %v2306_v35 = vadd.f32 %v2246_v1, %v2074_v36 }
 0x2b4   : > { %v2346_v51 = vadd.f32 %v3644_v50, %v2306_v35 }
 0x2b5   : > { %v1736_v24 = vpop.f32.mrf.mxu2 }
 0x2b6   : > { %v2382_v4 = vmax.f32 %v2346_v51, 0.0  ;;  %v1795_v28 = vadd.f32 %v1736_v24, %v1639_v62  ;;  %v1583_v6 = vpop.f32.mrf.mxu1  ;;  %v4009_v51 = vld [vmem:[#allocation21_spill] sm:$0xff] }
 0x2b7   : > { %v1640_v52 = vadd.f32 %v1583_v6, %v4005_v34 }
 0x2b8   : > { %2418 = vst [vmem:[%s3654_s16 + $0xa0] sm:$0xff] %v2382_v4  ;;  %v2075_v38 = vadd.f32 %v2016_v20, %v1795_v28  ;;  %v2251_v22 = vpop.f32.mrf.mxu0  ;;  %v2026_v44 = vpop.f32.mrf.mxu3 }
 0x2ba   : > { %v2307_v37 = vadd.f32 %v2248_v25, %v2075_v38 }
 0x2bc   : > { %v2347_v61 = vadd.f32 %v3644_v50, %v2307_v37 }
 0x2bd   : > { %v1739_v16 = vpop.f32.mrf.mxu2 }
 0x2be   : > { %v2383_v2 = vmax.f32 %v2347_v61, 0.0  ;;  %v1796_v33 = vadd.f32 %v1739_v16, %v1640_v52  ;;  %v1585_v12 = vpop.f32.mrf.mxu1  ;;  %v4010_v61 = vld [vmem:[#allocation18_spill] sm:$0xff] }
 0x2bf   : > { %v1641_v46 = vadd.f32 %v1585_v12, %v4006_v32 }
 0x2c0   : > { %2419 = vst [vmem:[%s3654_s16 + $0xa8] sm:$0xff] %v2383_v2  ;;  %v2076_v17 = vadd.f32 %v2019_v39, %v1796_v33  ;;  %v2253_v13 = vpop.f32.mrf.mxu0  ;;  %v2029_v9 = vpop.f32.mrf.mxu3 }
 0x2c2   : > { %v2308_v5 = vadd.f32 %v2251_v22, %v2076_v17 }
 0x2c4   : > { %v2348_v57 = vadd.f32 %v3644_v50, %v2308_v5 }
 0x2c5   : > { %v1741_v3 = vpop.f32.mrf.mxu2 }
 0x2c6   : > { %v2384_v20 = vmax.f32 %v2348_v57, 0.0  ;;  %v1797_v47 = vadd.f32 %v1741_v3, %v1641_v46  ;;  %v1588_v43 = vpop.f32.mrf.mxu1 }
 0x2c7   : > { %v1642_v0 = vadd.f32 %v1588_v43, %v4007_v15 }
 0x2c8   : > { %2420 = vst [vmem:[%s3654_s16 + $0xb0] sm:$0xff] %v2384_v20  ;;  %v2077_v60 = vadd.f32 %v2021_v18, %v1797_v47  ;;  %v2256_v41 = vpop.f32.mrf.mxu0  ;;  %v2031_v54 = vpop.f32.mrf.mxu3 }
 0x2ca   : > { %v2309_v56 = vadd.f32 %v2253_v13, %v2077_v60 }
 0x2cc   : > { %v2349_v11 = vadd.f32 %v3644_v50, %v2309_v56 }
 0x2cd   : > { %v1744_v7 = vpop.f32.mrf.mxu2 }
 0x2ce   : > { %v2385_v39 = vmax.f32 %v2349_v11, 0.0  ;;  %v1798_v53 = vadd.f32 %v1744_v7, %v1642_v0  ;;  %v1590_v27 = vpop.f32.mrf.mxu1 }
 0x2cf   : > { %v1643_v55 = vadd.f32 %v1590_v27, %v4008_v58 }
 0x2d0   : > { %2421 = vst [vmem:[%s3654_s16 + $0xb8] sm:$0xff] %v2385_v39  ;;  %v2078_v59 = vadd.f32 %v2024_v40, %v1798_v53  ;;  %v2258_v8 = vpop.f32.mrf.mxu0  ;;  %v2034_v22 = vpop.f32.mrf.mxu3 }
 0x2d2   : > { %v2310_v1 = vadd.f32 %v2256_v41, %v2078_v59 }
 0x2d4   : > { %v2350_v21 = vadd.f32 %v3644_v50, %v2310_v1 }
 0x2d5   : > { %v1746_v45 = vpop.f32.mrf.mxu2 }
 0x2d6   : > { %v2386_v48 = vmax.f32 %v2350_v21, 0.0  ;;  %v1799_v63 = vadd.f32 %v1746_v45, %v1643_v55  ;;  %v1593_v10 = vpop.f32.mrf.mxu1 }
 0x2d7   : > { %v1644_v42 = vadd.f32 %v1593_v10, %v4009_v51 }
 0x2d8   : > { %2422 = vst [vmem:[%s3654_s16 + $0xc0] sm:$0xff] %v2386_v48  ;;  %v2079_v18 = vadd.f32 %v2026_v44, %v1799_v63  ;;  %v2261_v36 = vpop.f32.mrf.mxu0  ;;  %v2036_v5 = vpop.f32.mrf.mxu3 }
 0x2da   : > { %v2311_v25 = vadd.f32 %v2258_v8, %v2079_v18 }
 0x2dc   : > { %v2351_v35 = vadd.f32 %v3644_v50, %v2311_v25 }
 0x2dd   : > { %v1749_v62 = vpop.f32.mrf.mxu2 }
 0x2de   : > { %v2387_v24 = vmax.f32 %v2351_v35, 0.0  ;;  %v1800_v4 = vadd.f32 %v1749_v62, %v1644_v42  ;;  %v1595_v28 = vpop.f32.mrf.mxu1 }
 0x2df   : > { %v1645_v34 = vadd.f32 %v1595_v28, %v4010_v61 }
 0x2e0   : > { %2423 = vst [vmem:[%s3654_s16 + $0xc8] sm:$0xff] %v2387_v24  ;;  %v2080_v6 = vadd.f32 %v2029_v9, %v1800_v4  ;;  %v2263_v38 = vpop.f32.mrf.mxu0  ;;  %v2039_v15 = vpop.f32.mrf.mxu3 }
 0x2e2   : > { %v2312_v40 = vadd.f32 %v2261_v36, %v2080_v6 }
 0x2e4   : > { %v2352_v37 = vadd.f32 %v3644_v50, %v2312_v40 }
 0x2e5   : > { %v1751_v52 = vpop.f32.mrf.mxu2 }
 0x2e6   : > { %v2388_v16 = vmax.f32 %v2352_v37, 0.0  ;;  %v1801_v2 = vadd.f32 %v1751_v52, %v1645_v34  ;;  %v1598_v33 = vpop.f32.mrf.mxu1 }
 0x2e7   : > { %v1646_v57 = vadd.f32 %v1598_v33, %v3578_v29 }
 0x2e8   : > { %2424 = vst [vmem:[%s3654_s16 + $0xd0] sm:$0xff] %v2388_v16  ;;  %v2081_v12 = vadd.f32 %v2031_v54, %v1801_v2  ;;  %v2266_v17 = vpop.f32.mrf.mxu0 }
 0x2ea   : > { %v2313_v13 = vadd.f32 %v2263_v38, %v2081_v12 }
 0x2ec   : > { %v2353_v44 = vadd.f32 %v3644_v50, %v2313_v13 }
 0x2ed   : > { %v1754_v32 = vpop.f32.mrf.mxu2 }
 0x2ee   : > { %v2389_v46 = vmax.f32 %v2353_v44, 0.0  ;;  %v1802_v3 = vadd.f32 %v1754_v32, %v1646_v57  ;;  %v1600_v20 = vpop.f32.mrf.mxu1 }
 0x2ef   : > { %v1647_v56 = vadd.f32 %v1600_v20, %v3588_v26  ;;  %v2041_v26 = vpop.f32.mrf.mxu3 }
 0x2f0   : > { %2425 = vst [vmem:[%s3654_s16 + $0xd8] sm:$0xff] %v2389_v46  ;;  %v2082_v47 = vadd.f32 %v2034_v22, %v1802_v3  ;;  %v2268_v43 = vpop.f32.mrf.mxu0 }
 0x2f2   : > { %v2314_v60 = vadd.f32 %v2266_v17, %v2082_v47 }
 0x2f4   : > { %v2354_v41 = vadd.f32 %v3644_v50, %v2314_v60 }
 0x2f5   : > { %v1756_v11 = vpop.f32.mrf.mxu2 }
 0x2f6   : > { %v2390_v0 = vmax.f32 %v2354_v41, 0.0  ;;  %v1803_v7 = vadd.f32 %v1756_v11, %v1647_v56  ;;  %v1603_v9 = vpop.f32.mrf.mxu1 }
 0x2f7   : > { %v1648_v59 = vadd.f32 %v1603_v9, %v3594_v30  ;;  %v2044_v35 = vpop.f32.mrf.mxu3 }
 0x2f8   : > { %2426 = vst [vmem:[%s3654_s16 + $0xe0] sm:$0xff] %v2390_v0  ;;  %v2083_v29 = vadd.f32 %v2036_v5, %v1803_v7  ;;  %v2271_v39 = vpop.f32.mrf.mxu0 }
 0x2fa   : > { %v2315_v53 = vadd.f32 %v2268_v43, %v2083_v29 }
 0x2fc   : > { %v2355_v27 = vadd.f32 %v3644_v50, %v2315_v53 }
 0x2fd   : > { %v1759_v8 = vpop.f32.mrf.mxu2 }
 0x2fe   : > { %v2391_v1 = vmax.f32 %v2355_v27, 0.0  ;;  %v1804_v21 = vadd.f32 %v1759_v8, %v1648_v59  ;;  %v1605_v58 = vpop.f32.mrf.mxu1 }
 0x2ff   : > { %v1649_v10 = vadd.f32 %v1605_v58, %v3604_v14  ;;  %v2046_v40 = vpop.f32.mrf.mxu3 }
 0x300   : > { %2427 = vst [vmem:[%s3654_s16 + $0xe8] sm:$0xff] %v2391_v1  ;;  %v2084_v55 = vadd.f32 %v2039_v15, %v1804_v21  ;;  %v2273_v45 = vpop.f32.mrf.mxu0 }
 0x302   : > { %v2316_v48 = vadd.f32 %v2271_v39, %v2084_v55 }
 0x304   : > { %v2356_v63 = vadd.f32 %v3644_v50, %v2316_v48 }
 0x305   : > { %v1761_v54 = vpop.f32.mrf.mxu2 }
 0x306   : > { %v2392_v18 = vmax.f32 %v2356_v63, 0.0  ;;  %v1805_v36 = vadd.f32 %v1761_v54, %v1649_v10  ;;  %v1608_v25 = vpop.f32.mrf.mxu1 }
 0x307   : > { %v1650_v24 = vadd.f32 %v1608_v25, %v3610_v31  ;;  %v2049_v5 = vpop.f32.mrf.mxu3 }
 0x308   : > { %2428 = vst [vmem:[%s3654_s16 + $0xf0] sm:$0xff] %v2392_v18  ;;  %v2085_v30 = vadd.f32 %v2041_v26, %v1805_v36  ;;  %v2276_v42 = vpop.f32.mrf.mxu0 }
 0x30a   : > { %v2317_v51 = vadd.f32 %v2273_v45, %v2085_v30 }
 0x30c   : > { %v2357_v62 = vadd.f32 %v3644_v50, %v2317_v51 }
 0x30d   : > { %v1764_v4 = vpop.f32.mrf.mxu2 }
 0x30e   : > { %v2393_v28 = vmax.f32 %v2357_v62, 0.0  ;;  %v1806_v6 = vadd.f32 %v1764_v4, %v1650_v24  ;;  %v1610_v38 = vpop.f32.mrf.mxu1 }
 0x30f   : > { %v1651_v61 = vadd.f32 %v1610_v38, %v3620_v19  ;;  %v2051_v11 = vpop.f32.mrf.mxu3 }
 0x310   : > { %2429 = vst [vmem:[%s3654_s16 + $0xf8] sm:$0xff] %v2393_v28  ;;  %v2086_v14 = vadd.f32 %v2044_v35, %v1806_v6  ;;  %v2278_v34 = vpop.f32.mrf.mxu0 }
 0x312   : > { %v2318_v22 = vadd.f32 %v2276_v42, %v2086_v14 }
 0x314   : > { %v2358_v37 = vadd.f32 %v3644_v50, %v2318_v22 }
 0x315   : > { %v1766_v52 = vpop.f32.mrf.mxu2 }
 0x316   : > { %v2394_v16 = vmax.f32 %v2358_v37, 0.0  ;;  %v1807_v2 = vadd.f32 %v1766_v52, %v1651_v61  ;;  %v1613_v33 = vpop.f32.mrf.mxu1 }
 0x317   : > { %v1652_v13 = vadd.f32 %v1613_v33, %v3626_v23 }
 0x318   : > { %2430 = vst [vmem:[%s3654_s16 + $0x100] sm:$0xff] %v2394_v16  ;;  %v2087_v31 = vadd.f32 %v2046_v40, %v1807_v2  ;;  %v2281_v46 = vpop.f32.mrf.mxu0 }
 0x31a   : > { %v2319_v12 = vadd.f32 %v2278_v34, %v2087_v31 }
 0x31c   : > { %v2359_v17 = vadd.f32 %v3644_v50, %v2319_v12 }
 0x31d   : > { %v1769_v44 = vpop.f32.mrf.mxu2 }
 0x31e   : > { %v2395_v57 = vmax.f32 %v2359_v17, 0.0  ;;  %v1808_v32 = vadd.f32 %v1769_v44, %v1652_v13  ;;  %v1615_v3 = vpop.f32.mrf.mxu1 }
 0x31f   : > { %v1653_v43 = vadd.f32 %v1615_v3, %v3636_v49 }
 0x320   : > { %2431 = vst [vmem:[%s3654_s16 + $0x108] sm:$0xff] %v2395_v57  ;;  %v2088_v19 = vadd.f32 %v2049_v5, %v1808_v32  ;;  %v2283_v15 = vpop.f32.mrf.mxu0 }
 0x322   : > { %v2320_v20 = vadd.f32 %v2281_v46, %v2088_v19 }
 0x324   : > { %v2360_v47 = vadd.f32 %v3644_v50, %v2320_v20 }
 0x325   : > { %v1771_v60 = vpop.f32.mrf.mxu2 }
 0x326   : > { %v2396_v41 = vmax.f32 %v2360_v47, 0.0  ;;  %v1809_v56 = vadd.f32 %v1771_v60, %v1653_v43 }
 0x328   : > { %2432 = vst [vmem:[%s3654_s16 + $0x110] sm:$0xff] %v2396_v41  ;;  %v2089_v23 = vadd.f32 %v2051_v11, %v1809_v56 }
 0x32a   : > { %v2321_v0 = vadd.f32 %v2283_v15, %v2089_v23 }
 0x32c   : > { %v2361_v7 = vadd.f32 %v3644_v50, %v2321_v0 }
 0x32e   : > { %v2397_v9 = vmax.f32 %v2361_v7, 0.0 }
 0x330   : > { %2433 = vst [vmem:[%s3654_s16 + $0x118] sm:$0xff] %v2397_v9 }
 0x331 PF: > { %s13_s12 = sadd.s32 1, %s2805_s12  }
 0x332   : > { %p10_p4 = scmp.ge.s32.totalorder %s13_s12, 4  }
 0x334   :  { %12 = sbr.rel (!%p10_p4) target bundleno = 1 (0x1), region = 70 }

</bundles_post_ra>
